<compile_context>
chip_gen: v5e
topology: v5e:2x2
jax: 0.10.0
libtpu: 0.0.40
codegen_flags: <defaults>
</compile_context>

<pallas_src>
import functools

import jax
import jax.numpy as jnp
from jax import lax
from jax.experimental import pallas as pl
from jax.experimental.pallas import tpu as pltpu

BN_EPS = 1e-5   # PyTorch BatchNorm2d default eps
PADL = 128      # lane halo on each side of the flattened spatial axis (>= W+1)


def _down_block_kernel(H, W, Cin, Cout,
                       x_ref, w1_ref, p1_ref, w2_ref, p2_ref,
                       o_ref, pad1_ref, pad2_ref):
    HW = H * W

    # Column masks for the +/-1 horizontal taps (computed once per step).
    col = lax.broadcasted_iota(jnp.int32, (1, HW), 1) % W
    mask_l = (col != 0).astype(jnp.float32)        # kills wrap when dx = -1
    mask_r = (col != W - 1).astype(jnp.float32)    # kills wrap when dx = +1

    def conv3x3(x, pad_ref, w_ref, c):
        # x: (c, HW) channel-major.  pad_ref: (c, PADL + HW + PADL) scratch.
        # Clear only the halos (interior is fully overwritten) and place the
        # image at a 128-lane-aligned offset -> aligned, unmasked big store.
        pad_ref[:, pl.ds(0, PADL)] = jnp.zeros((c, PADL), jnp.float32)
        pad_ref[:, pl.ds(PADL + HW, PADL)] = jnp.zeros((c, PADL), jnp.float32)
        pad_ref[:, pl.ds(PADL, HW)] = x

        taps = []
        for k in range(9):                                   # 9 static taps
            dy, dx = k // 3 - 1, k % 3 - 1
            t = pad_ref[:, pl.ds(PADL + dy * W + dx, HW)]    # (c, HW)
            if dx == -1:
                t = t * mask_l
            elif dx == 1:
                t = t * mask_r
            taps.append(t)
        x9 = jnp.concatenate(taps, axis=0)                   # (9*c, HW)
        # Single lane-dense MXU matmul per conv: (Cout, 9c) @ (9c, HW).
        return jnp.dot(w_ref[...], x9, preferred_element_type=jnp.float32)

    def bias_bn_relu(y, p_ref):
        # p_ref columns: [conv_bias, gamma, beta, running_mean, running_var]
        bias = p_ref[:, 0:1]
        gamma = p_ref[:, 1:2]
        beta = p_ref[:, 2:3]
        mean = p_ref[:, 3:4]
        var = p_ref[:, 4:5]
        # TODO(synk): training-mode BatchNorm (batch statistics) is not
        # implemented; this reproduces eval-mode BN with running stats.
        scale = gamma * lax.rsqrt(var + BN_EPS)
        return jnp.maximum((y + bias - mean) * scale + beta, 0.0)

    x = x_ref[0]                                             # (Cin, HW)
    y = bias_bn_relu(conv3x3(x, pad1_ref, w1_ref, Cin), p1_ref)   # (Cout, HW)
    y = bias_bn_relu(conv3x3(y, pad2_ref, w2_ref, Cout), p2_ref)  # (Cout, HW)
    o_ref[0] = y                                             # lane-dense store


def unet_basic_down_block(x_nchw, w1, p1, w2, p2):
    """x_nchw: (N, Cin, H, W).  w*: (Cout, 9*Cin*) packed conv weights.
    p*: (Cout, 5) = [bias, gamma, beta, running_mean, running_var].
    Returns (N, Cout, H, W)."""
    N, Cin, H, W = x_nchw.shape
    Cout = w1.shape[0]
    HW = H * W
    x = x_nchw.reshape(N, Cin, HW).astype(jnp.float32)       # free reshape

    kernel = functools.partial(_down_block_kernel, H, W, Cin, Cout)

    out = pl.pallas_call(
        kernel,
        out_shape=jax.ShapeDtypeStruct((N, Cout, HW), jnp.float32),
        grid_spec=pltpu.PrefetchScalarGridSpec(
            num_scalar_prefetch=0,
            grid=(N,),
            in_specs=[
                pl.BlockSpec((1, Cin, HW), lambda n: (n, 0, 0)),
                pl.BlockSpec((Cout, 9 * Cin), lambda n: (0, 0)),   # w1
                pl.BlockSpec((Cout, 5), lambda n: (0, 0)),         # p1
                pl.BlockSpec((Cout, 9 * Cout), lambda n: (0, 0)),  # w2
                pl.BlockSpec((Cout, 5), lambda n: (0, 0)),         # p2
            ],
            out_specs=pl.BlockSpec((1, Cout, HW), lambda n: (n, 0, 0)),
            scratch_shapes=[
                pltpu.VMEM((Cin, PADL + HW + PADL), jnp.float32),
                pltpu.VMEM((Cout, PADL + HW + PADL), jnp.float32),
            ],
        ),
        compiler_params=pltpu.CompilerParams(
            dimension_semantics=("parallel",)),                    # 2 TCs on v7x
    )(x, w1, p1, w2, p2)

    return out.reshape(N, Cout, H, W)


def pack_conv_weight(w_oihw):
    """PyTorch OIHW (Cout, Cin, 3, 3) -> (Cout, 9*Cin), tap-major to match
    the kernel's tap concatenation order (k = ky*3 + kx, then Cin)."""
    co, ci, kh, kw = w_oihw.shape
    return jnp.transpose(w_oihw, (0, 2, 3, 1)).reshape(co, kh * kw * ci)


def pack_bn_params(bias, gamma, beta, mean, var):
    return jnp.stack([bias, gamma, beta, mean, var], axis=1)       # (Cout, 5)


def _reference(x, w1, b1, g1, be1, m1, v1, w2, b2, g2, be2, m2, v2):
    """Pure-JAX reference (eval-mode BN), NCHW convs with OIHW weights."""
    dn = ('NCHW', 'OIHW', 'NCHW')

    def stage(x, w, b, g, be, m, v):
        y = lax.conv_general_dilated(x, w, (1, 1), [(1, 1), (1, 1)],
                                     dimension_numbers=dn)
        y = y + b.reshape(1, -1, 1, 1)
        y = (y - m.reshape(1, -1, 1, 1)) * (
            g.reshape(1, -1, 1, 1) / jnp.sqrt(v.reshape(1, -1, 1, 1) + BN_EPS)
        ) + be.reshape(1, -1, 1, 1)
        return jnp.maximum(y, 0.0)

    return stage(stage(x, w1, b1, g1, be1, m1, v1), w2, b2, g2, be2, m2, v2)


if __name__ == "__main__":
    key = jax.random.PRNGKey(0)
    # Small, sublane-friendly shapes: input_channel=8 -> output_channel=16.
    N, Cin, Cout, H, W = 2, 8, 16, 16, 16

    ks = jax.random.split(key, 13)
    x = jax.random.normal(ks[0], (N, Cin, H, W), jnp.float32)

    w1 = 0.2 * jax.random.normal(ks[1], (Cout, Cin, 3, 3), jnp.float32)
    b1 = 0.1 * jax.random.normal(ks[2], (Cout,), jnp.float32)
    g1 = 1.0 + 0.1 * jax.random.normal(ks[3], (Cout,), jnp.float32)
    be1 = 0.1 * jax.random.normal(ks[4], (Cout,), jnp.float32)
    m1 = 0.1 * jax.random.normal(ks[5], (Cout,), jnp.float32)
    v1 = 0.5 + jax.random.uniform(ks[6], (Cout,), jnp.float32)

    w2 = 0.2 * jax.random.normal(ks[7], (Cout, Cout, 3, 3), jnp.float32)
    b2 = 0.1 * jax.random.normal(ks[8], (Cout,), jnp.float32)
    g2 = 1.0 + 0.1 * jax.random.normal(ks[9], (Cout,), jnp.float32)
    be2 = 0.1 * jax.random.normal(ks[10], (Cout,), jnp.float32)
    m2 = 0.1 * jax.random.normal(ks[11], (Cout,), jnp.float32)
    v2 = 0.5 + jax.random.uniform(ks[12], (Cout,), jnp.float32)

    out = unet_basic_down_block(
        x,
        pack_conv_weight(w1), pack_bn_params(b1, g1, be1, m1, v1),
        pack_conv_weight(w2), pack_bn_params(b2, g2, be2, m2, v2))
    out = jax.block_until_ready(out)

    ref = _reference(x, w1, b1, g1, be1, m1, v1, w2, b2, g2, be2, m2, v2)

    assert out.shape == (N, Cout, H, W), out.shape
    max_err = float(jnp.max(jnp.abs(out - ref)))
    assert jnp.allclose(out, ref, atol=2e-3, rtol=2e-3), max_err
    print("KERNEL_OK")
</pallas_src>

<mosaic_0001>
module attributes {stable_mosaic.version = 11 : i64} {
  func.func @_down_block_kernel(%arg0: i32, %arg1: memref<1x8x256xf32, #tpu.memory_space<vmem>>, %arg2: memref<16x72xf32, #tpu.memory_space<vmem>>, %arg3: memref<16x5xf32, #tpu.memory_space<vmem>>, %arg4: memref<16x144xf32, #tpu.memory_space<vmem>>, %arg5: memref<16x5xf32, #tpu.memory_space<vmem>>, %arg6: memref<1x16x256xf32, #tpu.memory_space<vmem>>, %arg7: memref<8x512xf32, #tpu.memory_space<vmem>>, %arg8: memref<16x512xf32, #tpu.memory_space<vmem>>) attributes {dimension_semantics = [#tpu.dimension_semantics<parallel>], iteration_bounds = array<i64: 2>, scalar_prefetch = 0 : i64, scratch_operands = 2 : i64, tpu.core_type = #tpu.core_type<tc>, window_params = [{transform_indices = @transform_0, window_bounds = array<i64: 1, 8, 256>}, {pipeline_mode = #tpu.pipeline_mode<synchronous>, transform_indices = @transform_1, window_bounds = array<i64: 16, 72>}, {pipeline_mode = #tpu.pipeline_mode<synchronous>, transform_indices = @transform_2, window_bounds = array<i64: 16, 5>}, {pipeline_mode = #tpu.pipeline_mode<synchronous>, transform_indices = @transform_3, window_bounds = array<i64: 16, 144>}, {pipeline_mode = #tpu.pipeline_mode<synchronous>, transform_indices = @transform_4, window_bounds = array<i64: 16, 5>}, {transform_indices = @transform_5, window_bounds = array<i64: 1, 16, 256>}]} {
    %0 = tpu.iota {dimensions = array<i32: 1>} : vector<1x256xi32>
    %c16_i32 = arith.constant 16 : i32
    %c0_i32 = arith.constant 0 : i32
    %1 = arith.cmpi eq, %c16_i32, %c0_i32 : i32
    %c1_i32 = arith.constant 1 : i32
    %2 = arith.select %1, %c1_i32, %c16_i32 : i32
    %3 = vector.broadcast %2 : i32 to vector<1x256xi32>
    %4 = arith.remsi %0, %3 : vector<1x256xi32>
    %c0_i32_0 = arith.constant 0 : i32
    %5 = vector.broadcast %c0_i32_0 : i32 to vector<1x256xi32>
    %6 = arith.cmpi ne, %4, %5 : vector<1x256xi32>
    %c0_i32_1 = arith.constant 0 : i32
    %7 = vector.broadcast %c0_i32_1 : i32 to vector<1x256xi32>
    %8 = arith.cmpi slt, %4, %7 : vector<1x256xi32>
    %c0_i32_2 = arith.constant 0 : i32
    %9 = arith.cmpi slt, %2, %c0_i32_2 : i32
    %10 = vector.broadcast %9 : i1 to vector<1x256xi1>
    %11 = vector.broadcast %10 : vector<1x256xi1> to vector<1x256xi1>
    %12 = arith.xori %8, %11 : vector<1x256xi1>
    %13 = arith.andi %12, %6 : vector<1x256xi1>
    %14 = vector.broadcast %2 : i32 to vector<1x256xi32>
    %15 = arith.addi %4, %14 : vector<1x256xi32>
    %16 = arith.select %13, %15, %4 : vector<1x256xi1>, vector<1x256xi32>
    %c0_i32_3 = arith.constant 0 : i32
    %17 = vector.broadcast %c0_i32_3 : i32 to vector<1x256xi32>
    %18 = arith.cmpi ne, %16, %17 : vector<1x256xi32>
    %19 = arith.extui %18 : vector<1x256xi1> to vector<1x256xi32>
    %20 = arith.sitofp %19 : vector<1x256xi32> to vector<1x256xf32>
    %c15_i32 = arith.constant 15 : i32
    %21 = vector.broadcast %c15_i32 : i32 to vector<1x256xi32>
    %22 = arith.cmpi ne, %16, %21 : vector<1x256xi32>
    %23 = arith.extui %22 : vector<1x256xi1> to vector<1x256xi32>
    %24 = arith.sitofp %23 : vector<1x256xi32> to vector<1x256xf32>
    %c0 = arith.constant 0 : index
    %c0_4 = arith.constant 0 : index
    %c0_5 = arith.constant 0 : index
    %25 = vector.load %arg1[%c0, %c0_4, %c0_5] : memref<1x8x256xf32, #tpu.memory_space<vmem>>, vector<1x8x256xf32>
    %26 = vector.shape_cast %25 : vector<1x8x256xf32> to vector<8x256xf32>
    %cst = arith.constant 0.000000e+00 : f32
    %27 = vector.broadcast %cst : f32 to vector<8x128xf32>
    %c0_6 = arith.constant 0 : index
    %c0_7 = arith.constant 0 : index
    %28 = vector.load %arg7[%c0_6, %c0_7] : memref<8x512xf32, #tpu.memory_space<vmem>>, vector<8x128xf32>
    tpu.vector_store %arg7[%c0_6, %c0_7], %27 {strides = array<i32>} : memref<8x512xf32, #tpu.memory_space<vmem>>, vector<8x128xf32>,
    %cst_8 = arith.constant 0.000000e+00 : f32
    %29 = vector.broadcast %cst_8 : f32 to vector<8x128xf32>
    %c0_9 = arith.constant 0 : index
    %c384 = arith.constant 384 : index
    %30 = vector.load %arg7[%c0_9, %c384] : memref<8x512xf32, #tpu.memory_space<vmem>>, vector<8x128xf32>
    tpu.vector_store %arg7[%c0_9, %c384], %29 {strides = array<i32>} : memref<8x512xf32, #tpu.memory_space<vmem>>, vector<8x128xf32>,
    %c0_10 = arith.constant 0 : index
    %c128 = arith.constant 128 : index
    %31 = vector.load %arg7[%c0_10, %c128] : memref<8x512xf32, #tpu.memory_space<vmem>>, vector<8x256xf32>
    tpu.vector_store %arg7[%c0_10, %c128], %26 {strides = array<i32>} : memref<8x512xf32, #tpu.memory_space<vmem>>, vector<8x256xf32>,
    %c0_11 = arith.constant 0 : index
    %c111 = arith.constant 111 : index
    %32 = vector.load %arg7[%c0_11, %c111] : memref<8x512xf32, #tpu.memory_space<vmem>>, vector<8x256xf32>
    %33 = vector.broadcast %20 : vector<1x256xf32> to vector<8x256xf32>
    %34 = arith.mulf %32, %33 : vector<8x256xf32>
    %c0_12 = arith.constant 0 : index
    %c112 = arith.constant 112 : index
    %35 = vector.load %arg7[%c0_12, %c112] : memref<8x512xf32, #tpu.memory_space<vmem>>, vector<8x256xf32>
    %c0_13 = arith.constant 0 : index
    %c113 = arith.constant 113 : index
    %36 = vector.load %arg7[%c0_13, %c113] : memref<8x512xf32, #tpu.memory_space<vmem>>, vector<8x256xf32>
    %37 = vector.broadcast %24 : vector<1x256xf32> to vector<8x256xf32>
    %38 = arith.mulf %36, %37 : vector<8x256xf32>
    %c0_14 = arith.constant 0 : index
    %c127 = arith.constant 127 : index
    %39 = vector.load %arg7[%c0_14, %c127] : memref<8x512xf32, #tpu.memory_space<vmem>>, vector<8x256xf32>
    %40 = vector.broadcast %20 : vector<1x256xf32> to vector<8x256xf32>
    %41 = arith.mulf %39, %40 : vector<8x256xf32>
    %c0_15 = arith.constant 0 : index
    %c128_16 = arith.constant 128 : index
    %42 = vector.load %arg7[%c0_15, %c128_16] : memref<8x512xf32, #tpu.memory_space<vmem>>, vector<8x256xf32>
    %c0_17 = arith.constant 0 : index
    %c129 = arith.constant 129 : index
    %43 = vector.load %arg7[%c0_17, %c129] : memref<8x512xf32, #tpu.memory_space<vmem>>, vector<8x256xf32>
    %44 = vector.broadcast %24 : vector<1x256xf32> to vector<8x256xf32>
    %45 = arith.mulf %43, %44 : vector<8x256xf32>
    %c0_18 = arith.constant 0 : index
    %c143 = arith.constant 143 : index
    %46 = vector.load %arg7[%c0_18, %c143] : memref<8x512xf32, #tpu.memory_space<vmem>>, vector<8x256xf32>
    %47 = vector.broadcast %20 : vector<1x256xf32> to vector<8x256xf32>
    %48 = arith.mulf %46, %47 : vector<8x256xf32>
    %c0_19 = arith.constant 0 : index
    %c144 = arith.constant 144 : index
    %49 = vector.load %arg7[%c0_19, %c144] : memref<8x512xf32, #tpu.memory_space<vmem>>, vector<8x256xf32>
    %c0_20 = arith.constant 0 : index
    %c145 = arith.constant 145 : index
    %50 = vector.load %arg7[%c0_20, %c145] : memref<8x512xf32, #tpu.memory_space<vmem>>, vector<8x256xf32>
    %51 = vector.broadcast %24 : vector<1x256xf32> to vector<8x256xf32>
    %52 = arith.mulf %50, %51 : vector<8x256xf32>
    %53 = tpu.concatenate %34, %35, %38, %41, %42, %45, %48, %49, %52 in 0 : vector<8x256xf32>, vector<8x256xf32>, vector<8x256xf32>, vector<8x256xf32>, vector<8x256xf32>, vector<8x256xf32>, vector<8x256xf32>, vector<8x256xf32>, vector<8x256xf32> -> vector<72x256xf32>
    %c0_21 = arith.constant 0 : index
    %c0_22 = arith.constant 0 : index
    %54 = vector.load %arg2[%c0_21, %c0_22] : memref<16x72xf32, #tpu.memory_space<vmem>>, vector<16x72xf32>
    %cst_23 = arith.constant dense<0.000000e+00> : vector<16x256xf32>
    %55 = tpu.matmul %54, %53, %cst_23 {dimension_numbers = #tpu.dot_dimension_numbers<[1], [0], [0], [1], [0, 0, 1, 1], [], []>} : vector<16x72xf32>, vector<72x256xf32>, vector<16x256xf32> -> vector<16x256xf32>
    %c0_24 = arith.constant 0 : index
    %c0_25 = arith.constant 0 : index
    %56 = vector.load %arg3[%c0_24, %c0_25] : memref<16x5xf32, #tpu.memory_space<vmem>>, vector<16x1xf32>
    %c0_26 = arith.constant 0 : index
    %c1 = arith.constant 1 : index
    %57 = vector.load %arg3[%c0_26, %c1] : memref<16x5xf32, #tpu.memory_space<vmem>>, vector<16x1xf32>
    %c0_27 = arith.constant 0 : index
    %c2 = arith.constant 2 : index
    %58 = vector.load %arg3[%c0_27, %c2] : memref<16x5xf32, #tpu.memory_space<vmem>>, vector<16x1xf32>
    %c0_28 = arith.constant 0 : index
    %c3 = arith.constant 3 : index
    %59 = vector.load %arg3[%c0_28, %c3] : memref<16x5xf32, #tpu.memory_space<vmem>>, vector<16x1xf32>
    %c0_29 = arith.constant 0 : index
    %c4 = arith.constant 4 : index
    %60 = vector.load %arg3[%c0_29, %c4] : memref<16x5xf32, #tpu.memory_space<vmem>>, vector<16x1xf32>
    %cst_30 = arith.constant 9.99999974E-6 : f32
    %61 = vector.broadcast %cst_30 : f32 to vector<16x1xf32>
    %62 = arith.addf %60, %61 : vector<16x1xf32>
    %63 = math.rsqrt %62 : vector<16x1xf32>
    %64 = arith.mulf %57, %63 : vector<16x1xf32>
    %65 = vector.broadcast %56 : vector<16x1xf32> to vector<16x256xf32>
    %66 = arith.addf %55, %65 : vector<16x256xf32>
    %67 = vector.broadcast %59 : vector<16x1xf32> to vector<16x256xf32>
    %68 = arith.subf %66, %67 : vector<16x256xf32>
    %69 = vector.broadcast %64 : vector<16x1xf32> to vector<16x256xf32>
    %70 = arith.mulf %68, %69 : vector<16x256xf32>
    %71 = vector.broadcast %58 : vector<16x1xf32> to vector<16x256xf32>
    %72 = arith.addf %70, %71 : vector<16x256xf32>
    %cst_31 = arith.constant 0.000000e+00 : f32
    %73 = vector.broadcast %cst_31 : f32 to vector<16x256xf32>
    %74 = arith.maximumf %72, %73 : vector<16x256xf32>
    %cst_32 = arith.constant 0.000000e+00 : f32
    %75 = vector.broadcast %cst_32 : f32 to vector<16x128xf32>
    %c0_33 = arith.constant 0 : index
    %c0_34 = arith.constant 0 : index
    %76 = vector.load %arg8[%c0_33, %c0_34] : memref<16x512xf32, #tpu.memory_space<vmem>>, vector<16x128xf32>
    tpu.vector_store %arg8[%c0_33, %c0_34], %75 {strides = array<i32>} : memref<16x512xf32, #tpu.memory_space<vmem>>, vector<16x128xf32>,
    %cst_35 = arith.constant 0.000000e+00 : f32
    %77 = vector.broadcast %cst_35 : f32 to vector<16x128xf32>
    %c0_36 = arith.constant 0 : index
    %c384_37 = arith.constant 384 : index
    %78 = vector.load %arg8[%c0_36, %c384_37] : memref<16x512xf32, #tpu.memory_space<vmem>>, vector<16x128xf32>
    tpu.vector_store %arg8[%c0_36, %c384_37], %77 {strides = array<i32>} : memref<16x512xf32, #tpu.memory_space<vmem>>, vector<16x128xf32>,
    %c0_38 = arith.constant 0 : index
    %c128_39 = arith.constant 128 : index
    %79 = vector.load %arg8[%c0_38, %c128_39] : memref<16x512xf32, #tpu.memory_space<vmem>>, vector<16x256xf32>
    tpu.vector_store %arg8[%c0_38, %c128_39], %74 {strides = array<i32>} : memref<16x512xf32, #tpu.memory_space<vmem>>, vector<16x256xf32>,
    %c0_40 = arith.constant 0 : index
    %c111_41 = arith.constant 111 : index
    %80 = vector.load %arg8[%c0_40, %c111_41] : memref<16x512xf32, #tpu.memory_space<vmem>>, vector<16x256xf32>
    %81 = vector.broadcast %20 : vector<1x256xf32> to vector<16x256xf32>
    %82 = arith.mulf %80, %81 : vector<16x256xf32>
    %c0_42 = arith.constant 0 : index
    %c112_43 = arith.constant 112 : index
    %83 = vector.load %arg8[%c0_42, %c112_43] : memref<16x512xf32, #tpu.memory_space<vmem>>, vector<16x256xf32>
    %c0_44 = arith.constant 0 : index
    %c113_45 = arith.constant 113 : index
    %84 = vector.load %arg8[%c0_44, %c113_45] : memref<16x512xf32, #tpu.memory_space<vmem>>, vector<16x256xf32>
    %85 = vector.broadcast %24 : vector<1x256xf32> to vector<16x256xf32>
    %86 = arith.mulf %84, %85 : vector<16x256xf32>
    %c0_46 = arith.constant 0 : index
    %c127_47 = arith.constant 127 : index
    %87 = vector.load %arg8[%c0_46, %c127_47] : memref<16x512xf32, #tpu.memory_space<vmem>>, vector<16x256xf32>
    %88 = vector.broadcast %20 : vector<1x256xf32> to vector<16x256xf32>
    %89 = arith.mulf %87, %88 : vector<16x256xf32>
    %c0_48 = arith.constant 0 : index
    %c128_49 = arith.constant 128 : index
    %90 = vector.load %arg8[%c0_48, %c128_49] : memref<16x512xf32, #tpu.memory_space<vmem>>, vector<16x256xf32>
    %c0_50 = arith.constant 0 : index
    %c129_51 = arith.constant 129 : index
    %91 = vector.load %arg8[%c0_50, %c129_51] : memref<16x512xf32, #tpu.memory_space<vmem>>, vector<16x256xf32>
    %92 = vector.broadcast %24 : vector<1x256xf32> to vector<16x256xf32>
    %93 = arith.mulf %91, %92 : vector<16x256xf32>
    %c0_52 = arith.constant 0 : index
    %c143_53 = arith.constant 143 : index
    %94 = vector.load %arg8[%c0_52, %c143_53] : memref<16x512xf32, #tpu.memory_space<vmem>>, vector<16x256xf32>
    %95 = vector.broadcast %20 : vector<1x256xf32> to vector<16x256xf32>
    %96 = arith.mulf %94, %95 : vector<16x256xf32>
    %c0_54 = arith.constant 0 : index
    %c144_55 = arith.constant 144 : index
    %97 = vector.load %arg8[%c0_54, %c144_55] : memref<16x512xf32, #tpu.memory_space<vmem>>, vector<16x256xf32>
    %c0_56 = arith.constant 0 : index
    %c145_57 = arith.constant 145 : index
    %98 = vector.load %arg8[%c0_56, %c145_57] : memref<16x512xf32, #tpu.memory_space<vmem>>, vector<16x256xf32>
    %99 = vector.broadcast %24 : vector<1x256xf32> to vector<16x256xf32>
    %100 = arith.mulf %98, %99 : vector<16x256xf32>
    %101 = tpu.concatenate %82, %83, %86, %89, %90, %93, %96, %97, %100 in 0 : vector<16x256xf32>, vector<16x256xf32>, vector<16x256xf32>, vector<16x256xf32>, vector<16x256xf32>, vector<16x256xf32>, vector<16x256xf32>, vector<16x256xf32>, vector<16x256xf32> -> vector<144x256xf32>
    %c0_58 = arith.constant 0 : index
    %c0_59 = arith.constant 0 : index
    %102 = vector.load %arg4[%c0_58, %c0_59] : memref<16x144xf32, #tpu.memory_space<vmem>>, vector<16x144xf32>
    %cst_60 = arith.constant dense<0.000000e+00> : vector<16x256xf32>
    %103 = tpu.matmul %102, %101, %cst_60 {dimension_numbers = #tpu.dot_dimension_numbers<[1], [0], [0], [1], [0, 0, 1, 1], [], []>} : vector<16x144xf32>, vector<144x256xf32>, vector<16x256xf32> -> vector<16x256xf32>
    %c0_61 = arith.constant 0 : index
    %c0_62 = arith.constant 0 : index
    %104 = vector.load %arg5[%c0_61, %c0_62] : memref<16x5xf32, #tpu.memory_space<vmem>>, vector<16x1xf32>
    %c0_63 = arith.constant 0 : index
    %c1_64 = arith.constant 1 : index
    %105 = vector.load %arg5[%c0_63, %c1_64] : memref<16x5xf32, #tpu.memory_space<vmem>>, vector<16x1xf32>
    %c0_65 = arith.constant 0 : index
    %c2_66 = arith.constant 2 : index
    %106 = vector.load %arg5[%c0_65, %c2_66] : memref<16x5xf32, #tpu.memory_space<vmem>>, vector<16x1xf32>
    %c0_67 = arith.constant 0 : index
    %c3_68 = arith.constant 3 : index
    %107 = vector.load %arg5[%c0_67, %c3_68] : memref<16x5xf32, #tpu.memory_space<vmem>>, vector<16x1xf32>
    %c0_69 = arith.constant 0 : index
    %c4_70 = arith.constant 4 : index
    %108 = vector.load %arg5[%c0_69, %c4_70] : memref<16x5xf32, #tpu.memory_space<vmem>>, vector<16x1xf32>
    %cst_71 = arith.constant 9.99999974E-6 : f32
    %109 = vector.broadcast %cst_71 : f32 to vector<16x1xf32>
    %110 = arith.addf %108, %109 : vector<16x1xf32>
    %111 = math.rsqrt %110 : vector<16x1xf32>
    %112 = arith.mulf %105, %111 : vector<16x1xf32>
    %113 = vector.broadcast %104 : vector<16x1xf32> to vector<16x256xf32>
    %114 = arith.addf %103, %113 : vector<16x256xf32>
    %115 = vector.broadcast %107 : vector<16x1xf32> to vector<16x256xf32>
    %116 = arith.subf %114, %115 : vector<16x256xf32>
    %117 = vector.broadcast %112 : vector<16x1xf32> to vector<16x256xf32>
    %118 = arith.mulf %116, %117 : vector<16x256xf32>
    %119 = vector.broadcast %106 : vector<16x1xf32> to vector<16x256xf32>
    %120 = arith.addf %118, %119 : vector<16x256xf32>
    %cst_72 = arith.constant 0.000000e+00 : f32
    %121 = vector.broadcast %cst_72 : f32 to vector<16x256xf32>
    %122 = arith.maximumf %120, %121 : vector<16x256xf32>
    %c0_73 = arith.constant 0 : index
    %c0_74 = arith.constant 0 : index
    %c0_75 = arith.constant 0 : index
    %123 = vector.load %arg6[%c0_73, %c0_74, %c0_75] : memref<1x16x256xf32, #tpu.memory_space<vmem>>, vector<1x16x256xf32>
    %124 = vector.shape_cast %123 : vector<1x16x256xf32> to vector<16x256xf32>
    %125 = vector.shape_cast %122 : vector<16x256xf32> to vector<1x16x256xf32>
    tpu.vector_store %arg6[%c0_73, %c0_74, %c0_75], %125 {strides = array<i32>} : memref<1x16x256xf32, #tpu.memory_space<vmem>>, vector<1x16x256xf32>,
    return
  }
  func.func @transform_0(%arg0: i32) -> (i32, i32, i32) {
    %c0_i32 = arith.constant 0 : i32
    %c0_i32_0 = arith.constant 0 : i32
    %c0_i32_1 = arith.constant 0 : i32
    return %arg0, %c0_i32, %c0_i32_0 : i32, i32, i32
  }
  func.func @transform_1(%arg0: i32) -> (i32, i32) {
    %c0_i32 = arith.constant 0 : i32
    %c0_i32_0 = arith.constant 0 : i32
    %c0_i32_1 = arith.constant 0 : i32
    return %c0_i32, %c0_i32_0 : i32, i32
  }
  func.func @transform_2(%arg0: i32) -> (i32, i32) {
    %c0_i32 = arith.constant 0 : i32
    %c0_i32_0 = arith.constant 0 : i32
    %c0_i32_1 = arith.constant 0 : i32
    return %c0_i32, %c0_i32_0 : i32, i32
  }
  func.func @transform_3(%arg0: i32) -> (i32, i32) {
    %c0_i32 = arith.constant 0 : i32
    %c0_i32_0 = arith.constant 0 : i32
    %c0_i32_1 = arith.constant 0 : i32
    return %c0_i32, %c0_i32_0 : i32, i32
  }
  func.func @transform_4(%arg0: i32) -> (i32, i32) {
    %c0_i32 = arith.constant 0 : i32
    %c0_i32_0 = arith.constant 0 : i32
    %c0_i32_1 = arith.constant 0 : i32
    return %c0_i32, %c0_i32_0 : i32, i32
  }
  func.func @transform_5(%arg0: i32) -> (i32, i32, i32) {
    %c0_i32 = arith.constant 0 : i32
    %c0_i32_0 = arith.constant 0 : i32
    %c0_i32_1 = arith.constant 0 : i32
    return %arg0, %c0_i32, %c0_i32_0 : i32, i32, i32
  }
}

</mosaic_0001>

<bundles_post_ra>
// kernel: tpu_custom_call.1
= control target key start
LH: loop header
LB: loop body
LE: loop exit
PB: predicated region body
PF: predicated region fallthrough
CT: control target
= control target key end

     0   :  { %10 = vsyncpa [#allocation5], 0  ;;  %s2745_s0 = inlined_call_operand.vmem [shape: f32[2,8,256], index: 0, kind: input, shape index: {}]   ;;  %s2746_s1 = inlined_call_operand.hbm [shape: f32[16,72], index: 1, kind: input, shape index: {}]   ;;  %s2747_s2 = inlined_call_operand.vmem [shape: f32[16,5], index: 2, kind: input, shape index: {}]   ;;  %s2748_s3 = inlined_call_operand.hbm [shape: f32[16,144], index: 3, kind: input, shape index: {}]   ;;  %s2749_s4 = inlined_call_operand.vmem [shape: f32[16,5], index: 4, kind: input, shape index: {}]   ;;  %s2750_s5 = inlined_call_operand.hbm [shape: f32[2,16,256], index: 5, kind: output, shape index: {}]  }
   0x1   :  { %11 = vsyncpa [#allocation8], 0 }
   0x2   :  { %12 = vsyncpa [#allocation6], 0 }
   0x3   :  { %14 = vsyncpa [#allocation6 + $0x1], 0  ;;  %s2116_s18 = smov 0   ;;  %s2118_s19 = smov 0  }
   0x4   :  { %s2120_s20 = smov 0   ;;  %s2122_s21 = smov 0  }
   0x5 LB: > { %s2137_s22 = sadd.s32 4294967295, %s2058_s21   ;;  %s1405_s23 = sadd.s32 4294967294, %s2058_s21   ;;  %s2058_s21 = sphi %s2122_s21, %s2757_s21   ;;  %s2054_s20 = sphi %s2120_s20, %s2756_s20   ;;  %s2050_s19 = sphi %s2118_s19, %s2755_s19   ;;  %s2046_s18 = sphi %s2116_s18, %s2754_s18  }
   0x6   : > { %s2141_s24 = sadd.s32 1, %s2058_s21   ;;  %s137_s25 = sadd.s32 1, %s2054_s20 }
   0x7   : > { %s134_s26 = ssub.s32 %s2058_s21, %s2141_s24  ;;  %p147_p0 = scmp.ne.s32.totalorder %s2054_s20, %s2050_s19 }
   0x8   : > { %p135_p1 = scmp.eq.s32.totalorder %s134_s26, 0  ;;  %p148_p2 = scmp.eq.s32.totalorder %s2137_s22, 1 }
   0x9   : > { %p153_p3 = scmp.ne.s32.totalorder %s2050_s19, %s2046_s18  ;;  %p154_p4 = scmp.eq.s32.totalorder %s1405_s23, 1 }
   0xa   : > { %s2152_s27 = scalar_select %p135_p1, %s2054_s20, %s137_s25  }
   0xb   : > { %p2154_p5 = por %p148_p2, %p147_p0  ;;  %p2158_p6 = por %p154_p4, %p153_p3 }
   0xc   : > { %p1406_p7 = scmp.ge.s32.totalorder %s2058_s21, 1  ;;  %p161_p8 = scmp.lt.s32.totalorder %s2058_s21, 3 }
   0xd   : > { %p1456_p9 = scmp.eq.s32.totalorder %s2137_s22, 0  ;;  %s172_s8 = sshll.u32 %s2746_s1, 4  ;;  %s173_s8 = int_to_ptr.hbm [resolvable:$true] %s172_s8 }
   0xe   : > { %p2165_p10 = pnand %p1406_p7, %p161_p8  ;;  %s2060_s9 = smov [#allocation4]  }
   0xf   : > { %s174_s10 = sshll.u32 %s2060_s9, 4  ;;  %s189_s13 = sshll.u32 %s2748_s3, 4  ;;  %s175_s10 = int_to_ptr.vmem [resolvable:$true] %s174_s10  ;;  %s190_s13 = int_to_ptr.hbm [resolvable:$true] %s189_s13 }
  0x10   : > { %p1445_p11 = pneg %p2165_p10  ;;  %s2061_s14 = smov 128  }
  0x11   : > { %s2062_s15 = smov 8   ;;  %s2063_s16 = smov [#allocation7]  }
  0x12   : > { %p1446_p12 = pnand %p1456_p9, %p1445_p11  ;;  %s191_s17 = sshll.u32 %s2063_s16, 4  ;;  %s192_s17 = int_to_ptr.vmem [resolvable:$true] %s191_s17 }
  0x13   : > { %s2064_s23 = smov 256   ;;  %s2065_s25 = smov 16  }
  0x14   : > { %1448 = dma.hbm_to_vmem [thread:$0]  (!%p1446_p12), %s173_s8, 256, %s175_s10, [#allocation5], %s2061_s14, %s2061_s14, %s2062_s15  }
  0x15   : > { %1451 = dma.hbm_to_vmem [thread:$0]  (!%p1446_p12), %s190_s13, 512, %s192_s17, [#allocation8], %s2064_s23, %s2064_s23, %s2065_s25  }
  0x16   : > { %218 = sbr.rel (%p2165_p10) target bundleno = 1068 (0x42c), region = 40 }
  0x1b   : > { %2033 = dma.done.wait (%p1456_p9), [#allocation5], 256  }
  0x1c   : > { %2035 = vsyncadd (%p1456_p9), [#allocation5], 4294967040  ;;  %v257_v0 = vlaneseq }
  0x1d   : > { %2037 = dma.done.wait (%p1456_p9), [#allocation8], 512  }
  0x1e   : > { %2039 = vsyncadd (%p1456_p9), [#allocation8], 4294966784  ;;  %v258_v1 = vand.u32 127, %v257_v0  ;;  %v2066_v5 = vmov 0.0   ;;  %p252_p13 = scmp.lt.s32.totalorder %s2137_s22, 1  ;;  %s2067_s26 = smov 127  }
  0x1f   : > { %s2068_s30 = smov 111   ;;  %s2069_s6 = smov 15   ;;  %v2221_v19 = vld [vmem:[%s2747_s2 + $0x8] sm:$0xff]  ;;  %v2230_v21 = vld [vmem:[%s2747_s2] sm:$0xff]  ;;  %vm337_vm4 = vcmask 1039360   ;;  %vm352_vm5 = vcmask 7168  }
  0x20   : > { %v259_v2 = vadd.s32 128, %v258_v1  ;;  %v264_v3 = vand.u32 15, %v258_v1  ;;  %s253_s7 = scalar_select %p252_p13, %s2137_s22, 1  ;;  %v2224_v20 = vadd.f32 1e-05, %v2221_v19  ;;  %vm364_vm6 = vcmask 121856  }
  0x21   : > { %s2070_s9 = smov 1   ;;  %s2071_s10 = smov 113   ;;  %v2237_v26 = vadd.f32 1e-05, %v2230_v21  ;;  %vm325_vm7 = vcmask 924672   ;;  %vm376_vm8 = vcmask 138240  }
  0x22   : > { %v271_v4 = vand.u32 15, %v259_v2  ;;  %vm284_vm0 = vcmp.ne.s32.totalorder %v264_v3, 0  ;;  %vm290_vm2 = vcmp.ne.s32.totalorder %v264_v3, 15  ;;  %s1433_s8 = sshll.u32 %s253_s7, 4  ;;  %s2072_s11 = smov 17   ;;  %1920 = vrsqrt.f32 %v2224_v20 }
  0x23   : > { %v1416_v6 = vsel %vm284_vm0, 1.0, %v2066_v5  ;;  %v1418_v9 = vsel %vm290_vm2, 1.0, %v2066_v5  ;;  %s256_s14 = scalar_lea.vmem %s2745_s0, %s1433_s8  ;;  %s2073_s15 = smov 95   ;;  %1922 = vrsqrt.f32 %v2237_v26  ;;  %vm494_vm9 = vweird.f32 %v2224_v20 }
  0x24   : > { %vm285_vm1 = vcmp.ne.s32.totalorder %v271_v4, 0  ;;  %vm291_vm3 = vcmp.ne.s32.totalorder %v271_v4, 15  ;;  %v2201_v12 = vld [vmem:[%s256_s14 + $0x8] sm:$0xff]  ;;  %v2205_v13 = vld [vmem:[%s256_s14] sm:$0xff]  ;;  %s2074_s16 = smov 96   ;;  %s2075_s7 = smov 112   ;;  %vm484_vm13 = vweird.f32 %v2237_v26 }
  0x25   : > { %v1417_v7 = vsel %vm285_vm1, 1.0, %v2066_v5  ;;  %v1419_v10 = vsel %vm291_vm3, 1.0, %v2066_v5  ;;  %v1549_v14 = vpack.i.bf16 %v2205_v13, %v2066_v5  ;;  %v1559_v15 = vpack.i.bf16 %v2201_v12, %v2205_v13  ;;  %s2076_s8 = smov 110   ;;  %s2079_s12 = smov 125  }
  0x26   : > { %v1529_v8 = vpack.i.bf16 %v1417_v7, %v1416_v6  ;;  %v1534_v11 = vpack.i.bf16 %v1419_v10, %v1418_v9  ;;  %vm311_vm12 = vcmask 908288   ;;  %vm457_vm0 = vcmask 777216  }
  0x27   : > { %vm445_vm1 = vcmask 785408   ;;  %vm404_vm2 = vcmask 1031168   ;;  %vm469_vm3 = vcmask 769024  }
  0x28   : > { %1530 = vrot.lane.b32.xlu1 %v1529_v8, %s2067_s26  ;;  %1520 = vrot.lane.b32.xlu0 %v1529_v8, %s2068_s30  ;;  %v2249_v31 = vpop.eup %1920 }
  0x29   : > { %1540 = vrot.lane.b32.xlu2 %v1529_v8, %s2069_s6  ;;  %v489_v36 = vmul.f32 %v2249_v31, %v2224_v20  ;;  %v1923_v43 = vpop.eup %1922  ;;  %vm495_vm10 = vweird.f32 %v2249_v31 }
  0x2a   : > { %v479_v55 = vmul.f32 %v1923_v43, %v2237_v26  ;;  %vm496_vm11 = vmor %vm494_vm9, %vm495_vm10  ;;  %vm485_vm14 = vweird.f32 %v1923_v43 }
  0x2b   : > { %v490_v50 = vmul.f32 %v2249_v31, %v489_v36  ;;  %vm486_vm15 = vmor %vm484_vm13, %vm485_vm14  ;;  %vm1160_vm14 = vcmask 130048  }
  0x2c   : > { %v480_v61 = vmul.f32 %v1923_v43, %v479_v55 }
  0x2d   : > { %v491_v59 = vmul.f32 0.5, %v490_v50 }
  0x2e   : > { %v481_v4 = vmul.f32 0.5, %v480_v61 }
  0x2f   : > { %v492_v1 = vsub.f32 1.5, %v491_v59 }
  0x30   : > { %1535 = vrot.lane.b32.xlu1 %v1534_v11, %s2070_s9  ;;  %1525 = vrot.lane.b32.xlu0 %v1534_v11, %s2071_s10  ;;  %s2077_s9 = smov 126   ;;  %s2078_s10 = smov 94   ;;  %v482_v10 = vsub.f32 1.5, %v481_v4 }
  0x31   : > { %1545 = vrot.lane.b32.xlu2 %v1534_v11, %s2072_s11  ;;  %v493_v6 = vmul.f32 %v2249_v31, %v492_v1 }
  0x33   : > { %v497_v11 = vsel %vm496_vm11, %v2249_v31, %v493_v6 }
  0x38   : > { %391 = vrot.lane.b32.xlu1 %v2201_v12, %s2067_s26  ;;  %1550 = vrot.lane.b32.xlu0 %v1549_v14, %s2067_s26 }
  0x39   : > { %1560 = vrot.lane.b32.xlu2 %v1559_v15, %s2073_s15 }
  0x40   : > { %1555 = vrot.lane.b32.xlu0 %v1559_v15, %s2068_s30  ;;  %v483_v15 = vmul.f32 %v1923_v43, %v482_v10 }
  0x42   : > { %v487_v20 = vsel %vm486_vm15, %v1923_v43, %v483_v15 }
  0x83   : > { %v1541_v16 = vpop.permute.xlu2 %1540 }
  0x84   : > { %v1543_v17 = vunpack.i.h.bf16 %v1541_v16  ;;  %v2254_v33 = vunpack.i.l.bf16 %v1541_v16 }
  0x86   : > { %v2214_v18 = vmul.f32 0.0, %v1543_v17  ;;  %v2275_v48 = vsel %vm364_vm6, %v2254_v33, %v1543_v17  ;;  %v369_v54 = vmul.f32 %v2254_v33, %v2205_v13  ;;  %vm416_vm6 = vcmask 916480  }
  0x87   : > { %v370_v57 = vmul.f32 %v2275_v48, %v2201_v12 }
  0x88   : > { %443 = vrot.lane.b32.xlu1 %v2214_v18, %s2074_s16 }
  0x89   : > { %v1579_v63 = vpack.i.bf16 %v370_v57, %v369_v54  ;;  %v2081_v54 = vmov 1  }
  0x8a   : > { %1657 = vset.pattern.permute.xlu0 %v2081_v54 }
  0x8b   : > { %v1546_v47 = vpop.permute.xlu2 %1545 }
  0x8c   : > { %v1548_v52 = vunpack.i.h.bf16 %v1546_v47  ;;  %v2284_v53 = vunpack.i.l.bf16 %v1546_v47 }
  0x8e   : > { %v2298_v60 = vsel %vm376_vm8, %v2284_v53, %v1548_v52  ;;  %v2300_v62 = vmul.f32 0.0, %v1548_v52  ;;  %v381_v2 = vmul.f32 %v2284_v53, %v2205_v13 }
  0x8f   : > { %v382_v3 = vmul.f32 %v2298_v60, %v2201_v12 }
  0x91   : > { %v1584_v7 = vpack.i.bf16 %v382_v3, %v381_v2 }
  0x9a   : > { %v1531_v22 = vpop.permute.xlu1 %1530  ;;  %v2232_v23 = vpop.permute.xlu0 %1520 }
  0x9b   : > { %v2234_v24 = vunpack.i.h.bf16 %v1531_v22  ;;  %v1532_v25 = vunpack.i.l.bf16 %v1531_v22  ;;  %v2315_v8 = vunpack.i.h.bf16 %v2232_v23  ;;  %v1522_v9 = vunpack.i.l.bf16 %v2232_v23 }
  0x9d   : > { %v2241_v27 = vsel %vm337_vm4, %v1532_v25, %v2234_v24  ;;  %v2243_v28 = vmul.f32 0.0, %v1532_v25  ;;  %v344_v29 = vmul.f32 %v2234_v24, %v2201_v12  ;;  %v2325_v14 = vsel %vm311_vm12, %v1522_v9, %v2315_v8  ;;  %v1561_v25 = vpop.permute.xlu2 %1560 }
  0x9e   : > { %v343_v30 = vmul.f32 %v2241_v27, %v2205_v13  ;;  %v2328_v16 = vmul.f32 0.0, %v1522_v9  ;;  %v317_v17 = vmul.f32 %v2325_v14, %v2205_v13  ;;  %v1562_v43 = vunpack.i.l.bf16 %v1561_v25 }
  0x9f   : > { %414 = vrot.lane.b32.xlu2 %v344_v29, %s2075_s7 }
  0xa0   : > { %v1569_v32 = vpack.i.bf16 %v343_v30, %v2243_v28  ;;  %v1600_v22 = vpack.i.bf16 %v317_v17, %v2328_v16 }
  0xa2   : > { %v1536_v34 = vpop.permute.xlu1 %1535  ;;  %v1526_v35 = vpop.permute.xlu0 %1525  ;;  %1570 = vrot.lane.b32.xlu1 %v1569_v32, %s2075_s7 }
  0xa3   : > { %v1538_v37 = vunpack.i.h.bf16 %v1536_v34  ;;  %v2259_v38 = vunpack.i.l.bf16 %v1536_v34  ;;  %v2261_v39 = vunpack.i.h.bf16 %v1526_v35  ;;  %v1527_v40 = vunpack.i.l.bf16 %v1526_v35 }
  0xa4   : > { %v2080_v34 = vmov 0  }
  0xa5   : > { %v2263_v41 = vmul.f32 0.0, %v1538_v37  ;;  %v2266_v42 = vsel %vm352_vm5, %v2259_v38, %v1538_v37  ;;  %v332_v44 = vmul.f32 %v2261_v39, %v2201_v12  ;;  %v357_v45 = vmul.f32 %v2259_v38, %v2205_v13  ;;  %1589 = vset.pattern.permute.xlu2 %v2080_v34 }
  0xa6   : > { %v358_v46 = vmul.f32 %v2266_v42, %v2201_v12  ;;  %v2278_v49 = vsel %vm325_vm7, %v1527_v40, %v2261_v39  ;;  %v2289_v56 = vmul.f32 0.0, %v1527_v40  ;;  %v1563_v40 = vunpack.i.h.bf16 %v1561_v25 }
  0xa7   : > { %431 = vrot.lane.b32.xlu2 %v2263_v41, %s2076_s8  ;;  %402 = vrot.lane.b32.xlu0 %v332_v44, %s2077_s9  ;;  %v331_v58 = vmul.f32 %v2278_v49, %v2205_v13  ;;  %vm433_vm5 = vcmask 900096   ;;  %vm611_vm7 = vcmask 588800  }
  0xa8   : > { %v1574_v51 = vpack.i.bf16 %v358_v46, %v357_v45  ;;  %v458_v45 = vsel %vm457_vm0, %v1562_v43, %v1563_v40 }
  0xa9   : > { %v1564_v0 = vpack.i.bf16 %v331_v58, %v2289_v56 }
  0xaa   : > { %1575 = vrot.lane.b32.xlu1 %v1574_v51, %s2076_s8  ;;  %v2335_v23 = vpop.permute.xlu0 %1550  ;;  %v2349_v36 = vpop.permute.xlu1 %391 }
  0xaf   : > { %1580 = vrot.lane.b32.xlu0 %v1579_v63, %s2074_s16  ;;  %1565 = vrot.lane.b32.xlu2 %v1564_v0, %s2077_s9 }
  0xb2   : > { %467 = vrot.lane.b32.xlu1 %v2300_v62, %s2078_s10  ;;  %v2337_v26 = vpop.permute.xlu0 %1555 }
  0xb3   : > { %v1558_v29 = vunpack.i.h.bf16 %v2337_v26  ;;  %v1557_v30 = vunpack.i.l.bf16 %v2337_v26  ;;  %v1662_v26 = vpack.i.bf16 %v2214_v18, %v2214_v18 }
  0xb5   : > { %v423_v13 = vsel %vm311_vm12, %v1557_v30, %v1558_v29 }
  0xb6   : > { %v1595_v31 = vpack.i.bf16 %v423_v13, %v1557_v30 }
  0xb7   : > { %1585 = vrot.lane.b32.xlu0 %v1584_v7, %s2078_s10  ;;  %455 = vrot.lane.b32.xlu2 %v2066_v5, %s2073_s15 }
  0xba   : > { %502 = vrot.lane.b32.xlu1 %v497_v11, %s2079_s12 }
  0xbf   : > { %500 = vrot.lane.b32.xlu0 %v487_v20, %s2079_s12  ;;  %510 = vperm.xlu2 %1589, %v2230_v21  }
  0xc2   : > { %1601 = vrot.lane.b32.xlu1 %v1600_v22, %s2072_s11 }
  0xc7   : > { %1596 = vrot.lane.b32.xlu0 %v1595_v31, %s2072_s11 }
  0xf9   : > { %v2345_v32 = vpop.permute.xlu2 %414 }
  0xfa   : > { %v444_v44 = vpop.permute.xlu1 %443 }
 0x101   : > { %v432_v35 = vpop.permute.xlu2 %431 }
 0x109   : > { %v1566_v37 = vpop.permute.xlu2 %1565 }
 0x10a   : > { %v1568_v0 = vunpack.i.h.bf16 %v1566_v37  ;;  %v1567_v1 = vunpack.i.l.bf16 %v1566_v37 }
 0x10c   : > { %v405_v9 = vsel %vm404_vm2, %v1567_v1, %v1568_v0 }
 0x111   : > { %v456_v46 = vpop.permute.xlu2 %455 }
 0x112   : > { %v459_v47 = vsel %vm457_vm0, %v1563_v40, %v456_v46  ;;  %v318_v40 = vmul.f32 %v2315_v8, %v2201_v12 }
 0x113   : > { %v1590_v50 = vpack.i.bf16 %v459_v47, %v458_v45 }
 0x114   : > { %v1571_v51 = vpop.permute.xlu1 %1570 }
 0x115   : > { %1591 = vrot.lane.b32.xlu2 %v1590_v50, %s2072_s11  ;;  %v1572_v46 = vunpack.i.l.bf16 %v1571_v51 }
 0x119   : > { %v403_v52 = vpop.permute.xlu0 %402  ;;  %v2403_v18 = vpop.permute.xlu2 %510 }
 0x11a   : > { %v406_v3 = vsel %vm404_vm2, %v1568_v0, %v403_v52 }
 0x11b   : > { %v1650_v15 = vpack.i.bf16 %v406_v3, %v405_v9 }
 0x11c   : > { %v1576_v55 = vpop.permute.xlu1 %1575 }
 0x11d   : > { %v1578_v22 = vunpack.i.h.bf16 %v1576_v55  ;;  %v1577_v25 = vunpack.i.l.bf16 %v1576_v55  ;;  %v1553_v55 = vunpack.i.h.bf16 %v2335_v23 }
 0x11f   : > { %v434_v30 = vsel %vm433_vm5, %v1577_v25, %v1578_v22  ;;  %v435_v13 = vsel %vm433_vm5, %v1578_v22, %v432_v35 }
 0x120   : > { %v1625_v37 = vpack.i.bf16 %v435_v13, %v434_v30 }
 0x121   : > { %v1581_v57 = vpop.permute.xlu0 %1580 }
 0x122   : > { %v1583_v58 = vunpack.i.h.bf16 %v1581_v57  ;;  %v1582_v59 = vunpack.i.l.bf16 %v1581_v57  ;;  %v1552_v57 = vunpack.i.l.bf16 %v2335_v23  ;;  %v1667_v23 = vpack.i.bf16 %v2300_v62, %v2300_v62 }
 0x124   : > { %v446_v61 = vsel %vm445_vm1, %v1582_v59, %v1583_v58  ;;  %v468_v7 = vpop.permute.xlu1 %467  ;;  %v447_v31 = vsel %vm445_vm1, %v1583_v58, %v444_v44  ;;  %v394_v58 = vsel %vm337_vm4, %v1553_v55, %v2349_v36 }
 0x125   : > { %v1615_v63 = vpack.i.bf16 %v446_v61, %v1582_v59  ;;  %v1620_v45 = vpack.i.bf16 %v1577_v25, %v447_v31  ;;  %v393_v59 = vsel %vm337_vm4, %v1552_v57, %v1553_v55  ;;  %v1645_v61 = vpack.i.bf16 %v2349_v36, %v394_v58 }
 0x127   : > { %1616 = vrot.lane.b32.xlu0 %v1615_v63, %s2072_s11 }
 0x129   : > { %v1586_v2 = vpop.permute.xlu0 %1585 }
 0x12a   : > { %v1588_v4 = vunpack.i.h.bf16 %v1586_v2  ;;  %v1587_v6 = vunpack.i.l.bf16 %v1586_v2 }
 0x12c   : > { %v470_v10 = vsel %vm469_vm3, %v1587_v6, %v1588_v4  ;;  %v471_v11 = vsel %vm469_vm3, %v1588_v4, %v468_v7  ;;  %v503_v36 = vpop.permute.xlu1 %502 }
 0x12d   : > { %v1605_v17 = vpack.i.bf16 %v470_v10, %v1587_v6  ;;  %v1610_v20 = vpack.i.bf16 %v1562_v43, %v471_v11  ;;  %v1573_v43 = vunpack.i.h.bf16 %v1571_v51 }
 0x12f   : > { %1606 = vrot.lane.b32.xlu2 %v1605_v17, %s2072_s11  ;;  %1651 = vrot.lane.b32.xlu0 %v1650_v15, %s2072_s11  ;;  %v418_v35 = vsel %vm416_vm6, %v1573_v43, %v2345_v32  ;;  %v417_v50 = vsel %vm416_vm6, %v1572_v46, %v1573_v43 }
 0x130   : > { %1611 = vrot.lane.b32.xlu1 %v1610_v20, %s2072_s11  ;;  %v1640_v12 = vpack.i.bf16 %v2345_v32, %v418_v35  ;;  %v1630_v51 = vpack.i.bf16 %v417_v50, %v1558_v29  ;;  %v1635_v32 = vpack.i.bf16 %v393_v59, %v403_v52  ;;  %v2082_v29 = vmov 3  }
 0x131   : > { %v501_v47 = vpop.permute.xlu0 %500  ;;  %1655 = vset.pattern.permute.xlu1 %v2082_v29  ;;  %1656 = vset.pattern.permute.xlu2 %v2082_v29  ;;  %v507_v52 = vmul.f32 %v503_v36, %v2221_v19 }
 0x132   : > { %v506_v44 = vmul.f32 %v501_v47, %v2230_v21 }
 0x134   : > { %v2406_v4 = vpop.permute.xlu1 %1601 }
 0x137   : > { %1626 = vrot.lane.b32.xlu2 %v1625_v37, %s2072_s11  ;;  %525 = vrot.lane.b32.xlu0 %v318_v40, %s2072_s11 }
 0x138   : > { %1621 = vrot.lane.b32.xlu1 %v1620_v45, %s2072_s11 }
 0x139   : > { %v1597_v3 = vpop.permute.xlu0 %1596 }
 0x13a   : > { %v1599_v37 = vunpack.i.h.bf16 %v1597_v3  ;;  %v1598_v40 = vunpack.i.l.bf16 %v1597_v3 }
 0x13f   : > { %1641 = vrot.lane.b32.xlu2 %v1640_v12, %s2072_s11  ;;  %678 = vperm.xlu0 %1657, %v506_v44   ;;  %v2083_v44 = vmov 2  }
 0x140   : > { %1631 = vrot.lane.b32.xlu1 %v1630_v51, %s2072_s11  ;;  %v583_v51 = vsel %vm376_vm8, %v1598_v40, %v1599_v37 }
 0x147   : > { %1646 = vrot.lane.b32.xlu2 %v1645_v61, %s2072_s11  ;;  %1658 = vset.pattern.permute.xlu0 %v2080_v34 }
 0x148   : > { %1636 = vrot.lane.b32.xlu1 %v1635_v32, %s2072_s11  ;;  %515 = vperm.xlu0 %1658, %v2221_v19  }
 0x14f   : > { %669 = vperm.xlu2 %1656, %v2221_v19  }
 0x150   : > { %1663 = vrot.lane.b32.xlu0 %v1662_v26, %s2074_s16  ;;  %665 = vperm.xlu1 %1655, %v2230_v21  }
 0x157   : > { %1660 = vset.pattern.permute.xlu2 %v2083_v44 }
 0x158   : > { %1668 = vrot.lane.b32.xlu0 %v1667_v23, %s2078_s10  ;;  %1659 = vset.pattern.permute.xlu1 %v2081_v54 }
 0x159   : > { %683 = vperm.xlu1 %1659, %v507_v52   ;;  %691 = vperm.xlu2 %1660, %v2230_v21  }
 0x161   : > { %1661 = vset.pattern.permute.xlu1 %v2083_v44  ;;  %1913 = vset.pattern.permute.xlu2 %v2082_v29 }
 0x162   : > { %695 = vperm.xlu1 %1661, %v2221_v19  }
 0x16a   : > { %1912 = vset.pattern.permute.xlu1 %v2080_v34 }
 0x16f   : > { %v1592_v62 = vpop.permute.xlu2 %1591 }
 0x170   : > { %v1594_v7 = vunpack.i.h.bf16 %v1592_v62  ;;  %v1593_v9 = vunpack.i.l.bf16 %v1592_v62 }
 0x172   : > { %v590_v31 = vsel %vm376_vm8, %v1593_v9, %v1594_v7 }
 0x189   : > { %v1607_v63 = vpop.permute.xlu2 %1606 }
 0x18a   : > { %v1609_v0 = vunpack.i.h.bf16 %v1607_v63  ;;  %v1608_v1 = vunpack.i.l.bf16 %v1607_v63 }
 0x18c   : > { %v591_v2 = vsel %vm376_vm8, %v1608_v1, %v1609_v0  ;;  %v1604_v1 = vunpack.i.h.bf16 %v2406_v4 }
 0x18d   : > { %625 = vmatpush.msra.mxu0 %v591_v2  ;;  %v1603_v2 = vunpack.i.l.bf16 %v2406_v4 }
 0x191   : > { %v1627_v22 = vpop.permute.xlu2 %1626 }
 0x192   : > { %v1629_v43 = vunpack.i.h.bf16 %v1627_v22  ;;  %v1628_v46 = vunpack.i.l.bf16 %v1627_v22 }
 0x194   : > { %v586_v57 = vsel %vm376_vm8, %v1628_v46, %v1629_v43 }
 0x199   : > { %v1617_v6 = vpop.permute.xlu0 %1616  ;;  %v1642_v55 = vpop.permute.xlu2 %1641 }
 0x19a   : > { %v1619_v11 = vunpack.i.h.bf16 %v1617_v6  ;;  %v1618_v15 = vunpack.i.l.bf16 %v1617_v6  ;;  %v1644_v59 = vunpack.i.h.bf16 %v1642_v55  ;;  %v1643_v61 = vunpack.i.l.bf16 %v1642_v55 }
 0x19c   : > { %v587_v13 = vsel %vm376_vm8, %v1618_v15, %v1619_v11  ;;  %v582_v63 = vsel %vm376_vm8, %v1643_v61, %v1644_v59 }
 0x1a1   : > { %v1652_v58 = vpop.permute.xlu0 %1651 }
 0x1a2   : > { %v1612_v10 = vpop.permute.xlu1 %1611  ;;  %v1654_v26 = vunpack.i.h.bf16 %v1652_v58  ;;  %v1653_v23 = vunpack.i.l.bf16 %v1652_v58 }
 0x1a3   : > { %v1614_v17 = vunpack.i.h.bf16 %v1612_v10  ;;  %v1613_v20 = vunpack.i.l.bf16 %v1612_v10 }
 0x1a4   : > { %v579_v62 = vsel %vm376_vm8, %v1653_v23, %v1654_v26 }
 0x1a5   : > { %v589_v25 = vsel %vm376_vm8, %v1614_v17, %v1593_v9  ;;  %v592_v30 = vsel %vm376_vm8, %v1609_v0, %v1613_v20  ;;  %v1647_v0 = vpop.permute.xlu2 %1646  ;;  %v472_v17 = vld [vmem:[#allocation4] sm:$0xff]  ;;  %v575_v20 = vsel %vm376_vm8, %v1603_v2, %v1604_v1 }
 0x1a6   : > { %626 = vmatpush.msra.mxu0 %v589_v25  ;;  %648 = vmatpush.msra.mxu1 %v592_v30  ;;  %v1649_v6 = vunpack.i.h.bf16 %v1647_v0  ;;  %v1648_v7 = vunpack.i.l.bf16 %v1647_v0  ;;  %v473_v25 = vld [vmem:[#allocation4 + $0x8] sm:$0xff] }
 0x1a8   : > { %627 = vmatpush.msra.mxu0 %v587_v13  ;;  %649 = vmatpush.msra.mxu1 %v590_v31  ;;  %v578_v22 = vsel %vm376_vm8, %v1648_v7, %v1649_v6 }
 0x1a9   : > { %v526_v15 = vpop.permute.xlu0 %525 }
 0x1aa   : > { %v1622_v45 = vpop.permute.xlu1 %1621  ;;  %v576_v4 = vsel %vm376_vm8, %v1604_v1, %v526_v15 }
 0x1ab   : > { %v1624_v47 = vunpack.i.h.bf16 %v1622_v45  ;;  %v1623_v35 = vunpack.i.l.bf16 %v1622_v45 }
 0x1ad   : > { %v585_v50 = vsel %vm376_vm8, %v1624_v47, %v1628_v46  ;;  %v588_v12 = vsel %vm376_vm8, %v1619_v11, %v1623_v35  ;;  %v670_v30 = vpop.permute.xlu2 %669 }
 0x1ae   : > { %628 = vmatpush.msra.mxu0 %v585_v50  ;;  %650 = vmatpush.msra.mxu1 %v588_v12 }
 0x1b0   : > { %629 = vmatpush.msra.mxu0 %v583_v51  ;;  %651 = vmatpush.msra.mxu1 %v586_v57 }
 0x1b1   : > { %v679_v46 = vpop.permute.xlu0 %678 }
 0x1b2   : > { %v1632_v32 = vpop.permute.xlu1 %1631 }
 0x1b3   : > { %v1634_v36 = vunpack.i.h.bf16 %v1632_v32  ;;  %v1633_v52 = vunpack.i.l.bf16 %v1632_v32 }
 0x1b5   : > { %v581_v19 = vsel %vm376_vm8, %v1634_v36, %v1643_v61  ;;  %v584_v21 = vsel %vm376_vm8, %v1599_v37, %v1633_v52  ;;  %v692_v47 = vpop.permute.xlu2 %691 }
 0x1b6   : > { %630 = vmatpush.msra.mxu0 %v581_v19  ;;  %652 = vmatpush.msra.mxu1 %v584_v21 }
 0x1b8   : > { %631 = vmatpush.msra.mxu0 %v579_v62  ;;  %653 = vmatpush.msra.mxu1 %v582_v63 }
 0x1ba   : > { %v1637_v3 = vpop.permute.xlu1 %1636  ;;  %v516_v19 = vpop.permute.xlu0 %515 }
 0x1bb   : > { %v1639_v9 = vunpack.i.h.bf16 %v1637_v3  ;;  %v1638_v34 = vunpack.i.l.bf16 %v1637_v3 }
 0x1bd   : > { %v577_v10 = vsel %vm376_vm8, %v1639_v9, %v1648_v7  ;;  %v580_v11 = vsel %vm376_vm8, %v1654_v26, %v1638_v34 }
 0x1be   : > { %632 = vmatpush.msra.mxu0 %v577_v10  ;;  %654 = vmatpush.msra.mxu1 %v580_v11 }
 0x1c0   : > { %633 = vmatpush.msra.mxu0 %v575_v20  ;;  %655 = vmatpush.msra.mxu1 %v578_v22 }
 0x1c1   : > { %1420 = vmatmul.msk.f32.vlgmr.msra.gmra.mxu0 %vm611_vm7, %v472_v17 }
 0x1c2   : > { %656 = vmatpush.msra.mxu1 %v576_v4  ;;  %v666_v37 = vpop.permute.xlu1 %665 }
 0x1c3   : > { %1422 = vmatmul.msk.f32.vlgmr.msra.gmra.mxu1 %vm611_vm7, %v472_v17 }
 0x1c9   : > { %1421 = vmatmul.msk.f32.gmra.mxu0 %vm611_vm7, %v473_v25 }
 0x1cb   : > { %1423 = vmatmul.msk.f32.gmra.mxu1 %vm611_vm7, %v473_v25  ;;  %v684_v6 = vpop.permute.xlu1 %683 }
 0x23e   : > { %v635_v13 = vpop.f32.mrf.mxu0 }
 0x23f   : > { %v636_v31 = vadd.f32 %v635_v13, %v2403_v18  ;;  %v696_v13 = vpop.permute.xlu1 %695 }
 0x240   : > { %v658_v40 = vpop.f32.mrf.mxu1 }
 0x241   : > { %v672_v43 = vsub.f32 %v636_v31, %v666_v37  ;;  %v659_v45 = vadd.f32 %v658_v40, %v2403_v18 }
 0x243   : > { %v673_v35 = vsub.f32 %v659_v45, %v666_v37  ;;  %v686_v50 = vmul.f32 %v679_v46, %v672_v43 }
 0x245   : > { %v687_v12 = vmul.f32 %v679_v46, %v673_v35  ;;  %v698_v55 = vadd.f32 %v692_v47, %v686_v50 }
 0x246   : > { %v638_v21 = vpop.f32.mrf.mxu0 }
 0x247   : > { %v699_v51 = vadd.f32 %v692_v47, %v687_v12  ;;  %v702_v57 = vmax.f32 %v698_v55, 0.0  ;;  %v639_v1 = vadd.f32 %v638_v21, %v516_v19 }
 0x248   : > { %v661_v23 = vpop.f32.mrf.mxu1 }
 0x249   : > { %v703_v58 = vmax.f32 %v699_v51, 0.0  ;;  %v1672_v59 = vpack.i.bf16 %v702_v57, %v2066_v5  ;;  %v744_v26 = vmul.f32 %v2259_v38, %v702_v57  ;;  %v2446_v5 = vmul.f32 %v702_v57, %v2325_v14 }
 0x24a   : > { %v662_v62 = vadd.f32 %v661_v23, %v516_v19  ;;  %v727_v63 = vmul.f32 %v702_v57, %v2278_v49  ;;  %v750_v34 = vmul.f32 %v2254_v33, %v702_v57  ;;  %v674_v10 = vsub.f32 %v639_v1, %v670_v30 }
 0x24b   : > { %1673 = vrot.lane.b32.xlu2 %v1672_v59, %s2067_s26  ;;  %v1692_v61 = vpack.i.bf16 0.0, %v703_v58  ;;  %v745_v18 = vmul.f32 %v703_v58, %v2266_v42  ;;  %v1682_v32 = vpack.i.bf16 %v703_v58, %v702_v57  ;;  %v2442_v36 = vmul.f32 %v2315_v8, %v703_v58 }
 0x24c   : > { %v728_v2 = vmul.f32 %v2261_v39, %v703_v58  ;;  %v751_v3 = vmul.f32 %v703_v58, %v2275_v48  ;;  %v675_v7 = vsub.f32 %v662_v62, %v670_v30  ;;  %v1697_v9 = vpack.i.bf16 %v727_v63, %v2289_v56 }
 0x24d   : > { %1693 = vrot.lane.b32.xlu1 %v1692_v61, %s2073_s15  ;;  %1678 = vrot.lane.b32.xlu0 %v1692_v61, %s2067_s26  ;;  %v1717_v52 = vpack.i.bf16 %v745_v18, %v744_v26  ;;  %v1892_v0 = vpack.i.bf16 %v2442_v36, %v2446_v5  ;;  %v733_v20 = vmul.f32 %v702_v57, %v2241_v27 }
 0x24e   : > { %v1702_v11 = vpack.i.bf16 %v2289_v56, %v728_v2  ;;  %v1722_v15 = vpack.i.bf16 %v751_v3, %v750_v34  ;;  %v689_v17 = vmul.f32 %v684_v6, %v675_v7  ;;  %v688_v22 = vmul.f32 %v684_v6, %v674_v10 }
 0x24f   : > { %v734_v4 = vmul.f32 %v2234_v24, %v703_v58  ;;  %v757_v25 = vmul.f32 %v703_v58, %v2298_v60  ;;  %v1707_v30 = vpack.i.bf16 %v733_v20, %v2243_v28  ;;  %v756_v37 = vmul.f32 %v2284_v53, %v702_v57 }
 0x250   : > { %v701_v31 = vadd.f32 %v696_v13, %v689_v17  ;;  %v700_v56 = vadd.f32 %v696_v13, %v688_v22 }
 0x251   : > { %v1712_v40 = vpack.i.bf16 %v2243_v28, %v734_v4  ;;  %v1727_v43 = vpack.i.bf16 %v757_v25, %v756_v37 }
 0x252   : > { %v2468_v45 = vmax.f32 %v701_v31, 0.0  ;;  %v2472_v46 = vmax.f32 %v700_v56, 0.0 }
 0x253   : > { %1683 = vrot.lane.b32.xlu2 %v1682_v32, %s2068_s30 }
 0x254   : > { %v1742_v47 = vpack.i.bf16 %v2468_v45, %v2472_v46  ;;  %v747_v28 = vmul.f32 %v2259_v38, %v2472_v46  ;;  %v748_v35 = vmul.f32 %v2468_v45, %v2266_v42  ;;  %v731_v50 = vmul.f32 %v2261_v39, %v2468_v45 }
 0x255   : > { %1688 = vrot.lane.b32.xlu0 %v1672_v59, %s2073_s15  ;;  %1718 = vrot.lane.b32.xlu1 %v1717_v52, %s2076_s8  ;;  %v730_v55 = vmul.f32 %v2472_v46, %v2278_v49  ;;  %v754_v38 = vmul.f32 %v2468_v45, %v2275_v48  ;;  %v753_v39 = vmul.f32 %v2254_v33, %v2472_v46 }
 0x256   : > { %v1757_v12 = vpack.i.bf16 %v747_v28, %v2263_v41  ;;  %v1762_v51 = vpack.i.bf16 %v2263_v41, %v748_v35  ;;  %v737_v42 = vmul.f32 %v2234_v24, %v2468_v45  ;;  %v736_v49 = vmul.f32 %v2472_v46, %v2241_v27  ;;  %v2509_v24 = vpop.permute.xlu0 %1663 }
 0x257   : > { %v1747_v57 = vpack.i.bf16 %v731_v50, %v730_v55  ;;  %v1767_v58 = vpack.i.bf16 %v754_v38, %v753_v39  ;;  %v760_v59 = vmul.f32 %v2468_v45, %v2298_v60  ;;  %v759_v48 = vmul.f32 %v2284_v53, %v2472_v46 }
 0x258   : > { %v1752_v41 = vpack.i.bf16 %v737_v42, %v736_v49  ;;  %v1666_v13 = vunpack.i.h.bf16 %v2509_v24  ;;  %v724_v5 = vmul.f32 %v2472_v46, %v2325_v14  ;;  %v725_v14 = vmul.f32 %v2315_v8, %v2468_v45  ;;  %v2643_v8 = vld [vmem:[%s2749_s4 + $0x8] sm:$0xff] }
 0x259   : > { %v1772_v61 = vpack.i.bf16 %v760_v59, %v759_v48  ;;  %v933_v45 = vadd.f32 1e-05, %v2643_v8 }
 0x25b   : > { %1698 = vrot.lane.b32.xlu2 %v1697_v9, %s2077_s9  ;;  %vm950_vm11 = vweird.f32 %v933_v45 }
 0x25d   : > { %1703 = vrot.lane.b32.xlu0 %v1702_v11, %s2077_s9  ;;  %1723 = vrot.lane.b32.xlu1 %v1722_v15, %s2074_s16 }
 0x25e   : > { %v2513_v32 = vpop.permute.xlu0 %1668 }
 0x263   : > { %1708 = vrot.lane.b32.xlu2 %v1707_v30, %s2075_s7 }
 0x265   : > { %1713 = vrot.lane.b32.xlu0 %v1712_v40, %s2075_s7  ;;  %1728 = vrot.lane.b32.xlu1 %v1727_v43, %s2078_s10 }
 0x26b   : > { %1743 = vrot.lane.b32.xlu2 %v1742_v47, %s2073_s15 }
 0x26d   : > { %1738 = vrot.lane.b32.xlu0 %v1742_v47, %s2068_s30  ;;  %1733 = vrot.lane.b32.xlu1 %v1742_v47, %s2067_s26  ;;  %s2008_s30 = scalar_lea.hbm %s2750_s5, 64 }
 0x273   : > { %1758 = vrot.lane.b32.xlu2 %v1757_v12, %s2076_s8 }
 0x275   : > { %1763 = vrot.lane.b32.xlu0 %v1762_v51, %s2076_s8  ;;  %1748 = vrot.lane.b32.xlu1 %v1747_v57, %s2077_s9 }
 0x27b   : > { %1768 = vrot.lane.b32.xlu2 %v1767_v58, %s2074_s16  ;;  %s1434_s16 = sshll.u32 %s2137_s22, 5 }
 0x27c   : > { %s1317_s6 = scalar_lea.hbm %s2750_s5, %s1434_s16 }
 0x27d   : > { %1753 = vrot.lane.b32.xlu1 %v1752_v41, %s2075_s7  ;;  %s1320_s8 = sshll.u32 %s1317_s6, 4  ;;  %s1321_s8 = int_to_ptr.hbm [resolvable:$true] %s1320_s8 }
 0x27e   : > { %s2002_s9 = sshra.s32 %s1321_s8, 4  ;;  %s2003_s9 = int_to_ptr.hbm [resolvable:$true] %s2002_s9 }
 0x27f   : > { %p2009_p3 = scmp.lt.s32.totalorder %s2003_s9, %s2750_s5 }
 0x283   : > { %1773 = vrot.lane.b32.xlu2 %v1772_v61, %s2078_s10  ;;  %s2004_s10 = scalar_lea.hbm %s2003_s9, 32 }
 0x284   : > { %p2005_p0 = scmp.ne.s32.totalorder %s2003_s9, %s2004_s10  ;;  %p2010_p4 = scmp.lt.s32.totalorder %s2008_s30, %s2004_s10 }
 0x286   : > { %p2006_p1 = pnand %p2005_p0, %p2154_p5  ;;  %p2011_p7 = por %p2010_p4, %p2009_p3 }
 0x288   : > { %p2007_p2 = pneg %p2006_p1 }
 0x28a   : > { %p2012_p8 = pnand %p2011_p7, %p2007_p2 }
 0x2a5   : > { %v2507_v33 = vpop.permute.xlu2 %1673 }
 0x2a6   : > { %v1675_v36 = vunpack.i.l.bf16 %v2507_v33 }
 0x2ad   : > { %v1684_v18 = vpop.permute.xlu2 %1683 }
 0x2ae   : > { %v1686_v10 = vunpack.i.h.bf16 %v1684_v18  ;;  %v1685_v11 = vunpack.i.l.bf16 %v1684_v18 }
 0x2b0   : > { %v836_v20 = vsel %vm311_vm12, %v1685_v11, %v1686_v10 }
 0x2b1   : > { %v1782_v22 = vpack.i.bf16 %v1686_v10, %v836_v20 }
 0x2b5   : > { %v2511_v27 = vpop.permute.xlu2 %1698 }
 0x2bd   : > { %v2515_v26 = vpop.permute.xlu2 %1708 }
 0x2be   : > { %v1710_v10 = vunpack.i.l.bf16 %v2515_v26 }
 0x2bf   : > { %v1694_v23 = vpop.permute.xlu1 %1693  ;;  %v2517_v52 = vpop.permute.xlu0 %1678 }
 0x2c0   : > { %v1696_v19 = vunpack.i.h.bf16 %v1694_v23  ;;  %v1695_v53 = vunpack.i.l.bf16 %v1694_v23  ;;  %v1711_v23 = vunpack.i.h.bf16 %v2515_v26  ;;  %v1680_v26 = vunpack.i.l.bf16 %v2517_v52 }
 0x2c2   : > { %v901_v9 = vsel %vm457_vm0, %v1695_v53, %v1696_v19 }
 0x2c5   : > { %v1744_v60 = vpop.permute.xlu2 %1743 }
 0x2c6   : > { %v1746_v21 = vunpack.i.h.bf16 %v1744_v60  ;;  %v1745_v62 = vunpack.i.l.bf16 %v1744_v60 }
 0x2c7   : > { %v1689_v63 = vpop.permute.xlu0 %1688  ;;  %v2519_v1 = vpop.permute.xlu1 %1718 }
 0x2c8   : > { %v902_v2 = vsel %vm457_vm0, %v1745_v62, %v1746_v21  ;;  %v1691_v3 = vunpack.i.h.bf16 %v1689_v63  ;;  %v1721_v28 = vunpack.i.h.bf16 %v2519_v1  ;;  %v1720_v35 = vunpack.i.l.bf16 %v2519_v1 }
 0x2c9   : > { %v1807_v6 = vpack.i.bf16 %v902_v2, %v1745_v62  ;;  %v1690_v49 = vunpack.i.l.bf16 %v1689_v63  ;;  %v1671_v1 = vunpack.i.h.bf16 %v2513_v32 }
 0x2ca   : > { %v900_v7 = vsel %vm457_vm0, %v1691_v3, %v1695_v53  ;;  %v856_v58 = vsel %vm433_vm5, %v1720_v35, %v1721_v28 }
 0x2cb   : > { %1808 = vrot.lane.b32.xlu1 %v1807_v6, %s2072_s11  ;;  %v1777_v34 = vpack.i.bf16 %v901_v9, %v900_v7  ;;  %v903_v60 = vsel %vm457_vm0, %v1746_v21, %v1690_v49  ;;  %v1701_v21 = vunpack.i.h.bf16 %v2511_v27 }
 0x2cc   : > { %v1812_v2 = vpack.i.bf16 %v1691_v3, %v903_v60 }
 0x2cd   : > { %1778 = vrot.lane.b32.xlu0 %v1777_v34, %s2072_s11  ;;  %v1759_v31 = vpop.permute.xlu2 %1758 }
 0x2ce   : > { %v1760_v47 = vunpack.i.l.bf16 %v1759_v31 }
 0x2cf   : > { %v2526_v15 = vpop.permute.xlu0 %1703  ;;  %v2528_v17 = vpop.permute.xlu1 %1723 }
 0x2d0   : > { %v1726_v4 = vunpack.i.h.bf16 %v2528_v17  ;;  %v1725_v25 = vunpack.i.l.bf16 %v2528_v17  ;;  %v857_v57 = vsel %vm433_vm5, %v1721_v28, %v1760_v47  ;;  %v1705_v9 = vunpack.i.l.bf16 %v2526_v15 }
 0x2d1   : > { %v1792_v59 = vpack.i.bf16 %v857_v57, %v856_v58 }
 0x2d2   : > { %v878_v56 = vsel %vm445_vm1, %v1725_v25, %v1726_v4  ;;  %v879_v40 = vsel %vm445_vm1, %v1726_v4, %v1666_v13  ;;  %v824_v13 = vsel %vm416_vm6, %v1710_v10, %v1711_v23 }
 0x2d3   : > { %v1787_v43 = vpack.i.bf16 %v879_v40, %v878_v56 }
 0x2d5   : > { %1783 = vrot.lane.b32.xlu0 %v1782_v22, %s2072_s11  ;;  %v1769_v38 = vpop.permute.xlu2 %1768  ;;  %v803_v22 = vsel %vm404_vm2, %v1701_v21, %v1705_v9 }
 0x2d6   : > { %v1771_v48 = vunpack.i.h.bf16 %v1769_v38  ;;  %v1770_v61 = vunpack.i.l.bf16 %v1769_v38  ;;  %v1852_v40 = vpack.i.bf16 %v1705_v9, %v803_v22  ;;  %v2624_v9 = vld [vmem:[%s2749_s4] sm:$0xff]  ;;  %v1670_v22 = vunpack.i.l.bf16 %v2513_v32 }
 0x2d7   : > { %v2535_v30 = vpop.permute.xlu0 %1713  ;;  %v2537_v37 = vpop.permute.xlu1 %1728 }
 0x2d8   : > { %v1715_v18 = vunpack.i.l.bf16 %v2535_v30  ;;  %v880_v53 = vsel %vm445_vm1, %v1770_v61, %v1771_v48 }
 0x2d9   : > { %v1827_v6 = vpack.i.bf16 %v880_v53, %v1770_v61  ;;  %v1731_v61 = vunpack.i.h.bf16 %v2537_v37 }
 0x2da   : > { %v825_v62 = vsel %vm416_vm6, %v1711_v23, %v1715_v18 }
 0x2db   : > { %v1797_v7 = vpack.i.bf16 %v1715_v18, %v825_v62  ;;  %v1730_v18 = vunpack.i.l.bf16 %v2537_v37  ;;  %v923_v62 = vsel %vm469_vm3, %v1731_v61, %v1671_v1 }
 0x2dd   : > { %1788 = vrot.lane.b32.xlu0 %v1787_v43, %s2072_s11 }
 0x2df   : > { %v1739_v50 = vpop.permute.xlu0 %1738  ;;  %v2546_v12 = vpop.permute.xlu1 %1733 }
 0x2e0   : > { %v1741_v55 = vunpack.i.h.bf16 %v1739_v50  ;;  %v1740_v51 = vunpack.i.l.bf16 %v1739_v50  ;;  %v1736_v47 = vunpack.i.h.bf16 %v2546_v12  ;;  %v1735_v28 = vunpack.i.l.bf16 %v2546_v12 }
 0x2e1   : > { %v1676_v50 = vunpack.i.h.bf16 %v2507_v33 }
 0x2e2   : > { %v837_v39 = vsel %vm311_vm12, %v1740_v51, %v1741_v55  ;;  %v1802_v42 = vpack.i.bf16 %v1685_v11, %v1741_v55  ;;  %v1761_v11 = vunpack.i.h.bf16 %v1759_v31  ;;  %v1665_v31 = vunpack.i.l.bf16 %v2509_v24 }
 0x2e3   : > { %v1817_v41 = vpack.i.bf16 %v837_v39, %v1740_v51  ;;  %v1681_v55 = vunpack.i.h.bf16 %v2517_v52  ;;  %v781_v57 = vsel %vm337_vm4, %v1676_v50, %v1680_v26  ;;  %v783_v12 = vsel %vm337_vm4, %v1735_v28, %v1736_v47 }
 0x2e4   : > { %1803 = vrot.lane.b32.xlu2 %v1802_v42, %s2072_s11  ;;  %v881_v51 = vsel %vm445_vm1, %v1771_v48, %v1665_v31  ;;  %v1867_v24 = vpack.i.bf16 %v1680_v26, %v781_v57  ;;  %v1716_v52 = vunpack.i.h.bf16 %v2535_v30  ;;  %v1700_v30 = vunpack.i.l.bf16 %v2511_v27 }
 0x2e5   : > { %1793 = vrot.lane.b32.xlu0 %v1792_v59, %s2072_s11  ;;  %1818 = vrot.lane.b32.xlu1 %v1817_v41, %s2072_s11  ;;  %v782_v38 = vsel %vm337_vm4, %v1681_v55, %v1735_v28  ;;  %v1832_v39 = vpack.i.bf16 %v1725_v25, %v881_v51 }
 0x2e6   : > { %v1857_v58 = vpack.i.bf16 %v783_v12, %v782_v38  ;;  %v802_v27 = vsel %vm404_vm2, %v1700_v30, %v1701_v21  ;;  %v1887_v21 = vpack.i.bf16 %v2328_v16, %v725_v14 }
 0x2e7   : > { %v2559_v19 = vpop.permute.xlu1 %1748  ;;  %v1764_v63 = vpop.permute.xlu0 %1763 }
 0x2e8   : > { %v1765_v34 = vunpack.i.l.bf16 %v1764_v63  ;;  %v1766_v42 = vunpack.i.h.bf16 %v1764_v63  ;;  %v1751_v23 = vunpack.i.h.bf16 %v2559_v19  ;;  %v1750_v60 = vunpack.i.l.bf16 %v2559_v19 }
 0x2e9   : > { %v922_v19 = vsel %vm469_vm3, %v1730_v18, %v1731_v61 }
 0x2ea   : > { %v858_v4 = vsel %vm433_vm5, %v1761_v11, %v1765_v34  ;;  %v859_v41 = vsel %vm433_vm5, %v1765_v34, %v1766_v42  ;;  %v805_v53 = vsel %vm404_vm2, %v1750_v60, %v1751_v23  ;;  %v1847_v63 = vpack.i.bf16 %v802_v27, %v1751_v23 }
 0x2eb   : > { %v1837_v43 = vpack.i.bf16 %v858_v4, %v1761_v11  ;;  %v1842_v17 = vpack.i.bf16 %v1720_v35, %v859_v41  ;;  %v1706_v35 = vunpack.i.h.bf16 %v2526_v15  ;;  %v780_v15 = vsel %vm337_vm4, %v1675_v36, %v1676_v50 }
 0x2ec   : > { %1813 = vrot.lane.b32.xlu2 %v1812_v2, %s2072_s11  ;;  %v1882_v34 = vpack.i.bf16 %v724_v5, %v2328_v16 }
 0x2ed   : > { %1828 = vrot.lane.b32.xlu1 %v1827_v6, %s2072_s11  ;;  %1798 = vrot.lane.b32.xlu0 %v1797_v7, %s2072_s11  ;;  %v804_v37 = vsel %vm404_vm2, %v1706_v35, %v1750_v60  ;;  %v1907_v6 = vpack.i.bf16 %v923_v62, %v922_v19  ;;  %v1862_v7 = vpack.i.bf16 %v780_v15, %v1736_v47 }
 0x2ee   : > { %v1877_v2 = vpack.i.bf16 %v805_v53, %v804_v37 }
 0x2ef   : > { %v1754_v20 = vpop.permute.xlu1 %1753 }
 0x2f0   : > { %v1756_v3 = vunpack.i.h.bf16 %v1754_v20  ;;  %v1755_v49 = vunpack.i.l.bf16 %v1754_v20  ;;  %v932_v20 = vadd.f32 1e-05, %v2624_v9 }
 0x2f2   : > { %v1822_v56 = vpack.i.bf16 %v824_v13, %v1756_v3  ;;  %v826_v59 = vsel %vm416_vm6, %v1716_v52, %v1755_v49  ;;  %v827_v48 = vsel %vm416_vm6, %v1755_v49, %v1756_v3  ;;  %1924 = vrsqrt.f32 %v932_v20 }
 0x2f3   : > { %v1872_v25 = vpack.i.bf16 %v827_v48, %v826_v59  ;;  %1926 = vrsqrt.f32 %v933_v45  ;;  %vm940_vm4 = vweird.f32 %v932_v20 }
 0x2f4   : > { %1823 = vrot.lane.b32.xlu2 %v1822_v56, %s2072_s11 }
 0x2f5   : > { %1838 = vrot.lane.b32.xlu1 %v1837_v43, %s2072_s11  ;;  %1853 = vrot.lane.b32.xlu0 %v1852_v40, %s2072_s11 }
 0x2f8   : > { %v1925_v16 = vpop.eup %1924 }
 0x2f9   : > { %v935_v13 = vmul.f32 %v1925_v16, %v932_v20  ;;  %vm941_vm9 = vweird.f32 %v1925_v16  ;;  %v1927_v43 = vpop.eup %1926 }
 0x2fa   : > { %vm942_vm10 = vmor %vm940_vm4, %vm941_vm9  ;;  %v945_v47 = vmul.f32 %v1927_v43, %v933_v45  ;;  %vm951_vm12 = vweird.f32 %v1927_v43 }
 0x2fb   : > { %v936_v32 = vmul.f32 %v1925_v16, %v935_v13  ;;  %vm952_vm13 = vmor %vm950_vm11, %vm951_vm12 }
 0x2fc   : > { %1833 = vrot.lane.b32.xlu2 %v1832_v39, %s2072_s11  ;;  %v946_v31 = vmul.f32 %v1927_v43, %v945_v47 }
 0x2fd   : > { %1858 = vrot.lane.b32.xlu1 %v1857_v58, %s2072_s11  ;;  %1868 = vrot.lane.b32.xlu0 %v1867_v24, %s2072_s11  ;;  %v937_v56 = vmul.f32 0.5, %v936_v32 }
 0x2fe   : > { %v947_v50 = vmul.f32 0.5, %v946_v31 }
 0x2ff   : > { %v938_v40 = vsub.f32 1.5, %v937_v56 }
 0x300   : > { %v948_v55 = vsub.f32 1.5, %v947_v50 }
 0x301   : > { %v939_v26 = vmul.f32 %v1925_v16, %v938_v40 }
 0x302   : > { %v949_v51 = vmul.f32 %v1927_v43, %v948_v55 }
 0x303   : > { %v943_v28 = vsel %vm942_vm10, %v1925_v16, %v939_v26 }
 0x304   : > { %1843 = vrot.lane.b32.xlu2 %v1842_v17, %s2072_s11  ;;  %v953_v57 = vsel %vm952_vm13, %v1927_v43, %v949_v51 }
 0x305   : > { %1873 = vrot.lane.b32.xlu1 %v1872_v25, %s2072_s11  ;;  %1893 = vrot.lane.b32.xlu0 %v1892_v0, %s2072_s11  ;;  %v1774_v0 = vpop.permute.xlu2 %1773 }
 0x306   : > { %v1776_v10 = vunpack.i.h.bf16 %v1774_v0  ;;  %v1775_v33 = vunpack.i.l.bf16 %v1774_v0 }
 0x308   : > { %v924_v46 = vsel %vm469_vm3, %v1775_v33, %v1776_v10  ;;  %v925_v3 = vsel %vm469_vm3, %v1776_v10, %v1670_v22 }
 0x309   : > { %v1897_v11 = vpack.i.bf16 %v924_v46, %v1775_v33  ;;  %v1902_v4 = vpack.i.bf16 %v1730_v18, %v925_v3 }
 0x30c   : > { %1848 = vrot.lane.b32.xlu2 %v1847_v63, %s2072_s11 }
 0x30d   : > { %1878 = vrot.lane.b32.xlu1 %v1877_v2, %s2072_s11  ;;  %1908 = vrot.lane.b32.xlu0 %v1907_v6, %s2072_s11 }
 0x314   : > { %1863 = vrot.lane.b32.xlu2 %v1862_v7, %s2072_s11 }
 0x315   : > { %1883 = vrot.lane.b32.xlu1 %v1882_v34, %s2072_s11  ;;  %966 = vperm.xlu0 %1658, %v2624_v9  }
 0x31c   : > { %1888 = vrot.lane.b32.xlu2 %v1887_v21, %s2072_s11 }
 0x31d   : > { %1898 = vrot.lane.b32.xlu1 %v1897_v11, %s2072_s11  ;;  %1916 = vset.pattern.permute.xlu0 %v2081_v54 }
 0x324   : > { %1903 = vrot.lane.b32.xlu2 %v1902_v4, %s2072_s11  ;;  %s249_s11 = sand.u32 1, %s2050_s19  }
 0x325   : > { %956 = vrot.lane.b32.xlu1 %v943_v28, %s2079_s12  ;;  %s1413_s15 = sshll.u32 %s249_s11, 5  ;;  %s1306_s22 = scalar_lea.sflag [#allocation6], %s249_s11 }
 0x326   : > { %s251_s17 = scalar_lea.vmem [#allocation9], %s1413_s15 }
 0x327   : > { %s1318_s7 = sshll.u32 %s251_s17, 4  ;;  %s1319_s7 = int_to_ptr.vmem [resolvable:$true] %s1318_s7 }
 0x32c   : > { %958 = vrot.lane.b32.xlu2 %v953_v57, %s2079_s12 }
 0x32d   : > { %971 = vperm.xlu1 %1912, %v2643_v8  }
 0x334   : > { %1260 = vperm.xlu2 %1913, %v2624_v9  }
 0x335   : > { %1914 = vset.pattern.permute.xlu1 %v2082_v29 }
 0x336   : > { %1264 = vperm.xlu1 %1914, %v2643_v8  }
 0x33c   : > { %1915 = vset.pattern.permute.xlu2 %v2081_v54 }
 0x33d   : > { %v1809_v38 = vpop.permute.xlu1 %1808 }
 0x33e   : > { %v1811_v12 = vunpack.i.h.bf16 %v1809_v38  ;;  %v1810_v39 = vunpack.i.l.bf16 %v1809_v38  ;;  %v2650_v24 = vpop.permute.xlu2 %1803  ;;  %1917 = vset.pattern.permute.xlu1 %v2083_v44 }
 0x33f   : > { %v1779_v42 = vpop.permute.xlu0 %1778  ;;  %1286 = vperm.xlu1 %1917, %v2624_v9   ;;  %v1805_v3 = vunpack.i.l.bf16 %v2650_v24  ;;  %v1806_v56 = vunpack.i.h.bf16 %v2650_v24 }
 0x340   : > { %v1118_v58 = vsel %vm376_vm8, %v1810_v39, %v1811_v12  ;;  %v1781_v52 = vunpack.i.h.bf16 %v1779_v42  ;;  %v1780_v41 = vunpack.i.l.bf16 %v1779_v42 }
 0x341   : > { %1167 = vmatpush.msra.mxu2 %v1118_v58 }
 0x342   : > { %v1117_v29 = vsel %vm376_vm8, %v1780_v41, %v1781_v52 }
 0x346   : > { %v1814_v49 = vpop.permute.xlu2 %1813 }
 0x347   : > { %v1816_v59 = vunpack.i.h.bf16 %v1814_v49  ;;  %v1815_v48 = vunpack.i.l.bf16 %v1814_v49  ;;  %v2656_v17 = vpop.permute.xlu0 %1783 }
 0x348   : > { %v1786_v4 = vunpack.i.h.bf16 %v2656_v17  ;;  %v1785_v16 = vunpack.i.l.bf16 %v2656_v17 }
 0x349   : > { %v1116_v25 = vsel %vm376_vm8, %v1816_v59, %v1780_v41  ;;  %v1119_v61 = vsel %vm376_vm8, %v1811_v12, %v1815_v48 }
 0x34a   : > { %1168 = vmatpush.msra.mxu2 %v1116_v25  ;;  %1213 = vmatpush.msra.mxu3 %v1119_v61  ;;  %v1104_v28 = vsel %vm376_vm8, %v1806_v56, %v1785_v16  ;;  %v1105_v31 = vsel %vm376_vm8, %v1785_v16, %v1786_v4 }
 0x34c   : > { %1214 = vmatpush.msra.mxu3 %v1117_v29 }
 0x34e   : > { %v2664_v18 = vpop.permute.xlu2 %1823 }
 0x34f   : > { %v1789_v23 = vpop.permute.xlu0 %1788  ;;  %v1825_v55 = vunpack.i.l.bf16 %v2664_v18  ;;  %v1826_v42 = vunpack.i.h.bf16 %v2664_v18 }
 0x350   : > { %v1791_v54 = vunpack.i.h.bf16 %v1789_v23  ;;  %v1790_v35 = vunpack.i.l.bf16 %v1789_v23 }
 0x352   : > { %v1113_v5 = vsel %vm376_vm8, %v1790_v35, %v1791_v54 }
 0x356   : > { %v1834_v30 = vpop.permute.xlu2 %1833 }
 0x357   : > { %v1819_v60 = vpop.permute.xlu1 %1818  ;;  %v1794_v1 = vpop.permute.xlu0 %1793  ;;  %v1836_v53 = vunpack.i.h.bf16 %v1834_v30  ;;  %v1835_v19 = vunpack.i.l.bf16 %v1834_v30 }
 0x358   : > { %v1796_v15 = vunpack.i.h.bf16 %v1794_v1  ;;  %v1795_v7 = vunpack.i.l.bf16 %v1794_v1  ;;  %v1821_v21 = vunpack.i.h.bf16 %v1819_v60  ;;  %v1820_v11 = vunpack.i.l.bf16 %v1819_v60 }
 0x359   : > { %v1112_v36 = vsel %vm376_vm8, %v1836_v53, %v1790_v35 }
 0x35a   : > { %v1109_v32 = vsel %vm376_vm8, %v1795_v7, %v1796_v15  ;;  %v1106_v40 = vsel %vm376_vm8, %v1820_v11, %v1821_v21  ;;  %v1107_v43 = vsel %vm376_vm8, %v1821_v21, %v1805_v3 }
 0x35e   : > { %v1844_v63 = vpop.permute.xlu2 %1843 }
 0x35f   : > { %v1829_v37 = vpop.permute.xlu1 %1828  ;;  %v1799_v0 = vpop.permute.xlu0 %1798  ;;  %v1846_v10 = vunpack.i.h.bf16 %v1844_v63  ;;  %v1845_v33 = vunpack.i.l.bf16 %v1844_v63 }
 0x360   : > { %v1831_v62 = vunpack.i.h.bf16 %v1829_v37  ;;  %v1830_v27 = vunpack.i.l.bf16 %v1829_v37  ;;  %v1801_v57 = vunpack.i.h.bf16 %v1799_v0  ;;  %v1800_v38 = vunpack.i.l.bf16 %v1799_v0 }
 0x361   : > { %v1108_v13 = vsel %vm376_vm8, %v1846_v10, %v1795_v7 }
 0x362   : > { %v1114_v2 = vsel %vm376_vm8, %v1830_v27, %v1831_v62  ;;  %v1115_v6 = vsel %vm376_vm8, %v1831_v62, %v1835_v19  ;;  %v1100_v52 = vsel %vm376_vm8, %v1826_v42, %v1800_v38  ;;  %v1101_v41 = vsel %vm376_vm8, %v1800_v38, %v1801_v57  ;;  %v929_v38 = vld [vmem:[#allocation7 + $0x18] sm:$0xff] }
 0x363   : > { %1169 = vmatpush.msra.mxu2 %v1114_v2  ;;  %1215 = vmatpush.msra.mxu3 %v1115_v6 }
 0x365   : > { %1170 = vmatpush.msra.mxu2 %v1112_v36  ;;  %1216 = vmatpush.msra.mxu3 %v1113_v5 }
 0x366   : > { %v1849_v45 = vpop.permute.xlu2 %1848 }
 0x367   : > { %v1839_v34 = vpop.permute.xlu1 %1838  ;;  %v1854_v26 = vpop.permute.xlu0 %1853  ;;  %v1851_v59 = vunpack.i.h.bf16 %v1849_v45  ;;  %v1850_v48 = vunpack.i.l.bf16 %v1849_v45 }
 0x368   : > { %v1841_v14 = vunpack.i.h.bf16 %v1839_v34  ;;  %v1840_v46 = vunpack.i.l.bf16 %v1839_v34  ;;  %v1856_v25 = vunpack.i.h.bf16 %v1854_v26  ;;  %v1855_v61 = vunpack.i.l.bf16 %v1854_v26 }
 0x36a   : > { %v1110_v20 = vsel %vm376_vm8, %v1840_v46, %v1841_v14  ;;  %v1111_v22 = vsel %vm376_vm8, %v1841_v14, %v1845_v33  ;;  %v1096_v27 = vsel %vm376_vm8, %v1851_v59, %v1855_v61  ;;  %v1097_v63 = vsel %vm376_vm8, %v1855_v61, %v1856_v25 }
 0x36b   : > { %1171 = vmatpush.msra.mxu2 %v1110_v20  ;;  %1217 = vmatpush.msra.mxu3 %v1111_v22  ;;  %v926_v20 = vld [vmem:[#allocation7] sm:$0xff] }
 0x36d   : > { %1172 = vmatpush.msra.mxu2 %v1108_v13  ;;  %1218 = vmatpush.msra.mxu3 %v1109_v32 }
 0x36e   : > { %v1864_v50 = vpop.permute.xlu2 %1863 }
 0x36f   : > { %v1859_v47 = vpop.permute.xlu1 %1858  ;;  %1173 = vmatpush.msra.mxu2 %v1106_v40  ;;  %1219 = vmatpush.msra.mxu3 %v1107_v43  ;;  %v1869_v24 = vpop.permute.xlu0 %1868  ;;  %v1865_v60 = vunpack.i.l.bf16 %v1864_v50  ;;  %v1866_v37 = vunpack.i.h.bf16 %v1864_v50 }
 0x370   : > { %v1861_v30 = vunpack.i.h.bf16 %v1859_v47  ;;  %v1860_v1 = vunpack.i.l.bf16 %v1859_v47  ;;  %v1871_v53 = vunpack.i.h.bf16 %v1869_v24  ;;  %v1870_v19 = vunpack.i.l.bf16 %v1869_v24 }
 0x371   : > { %1174 = vmatpush.msra.mxu2 %v1104_v28  ;;  %1220 = vmatpush.msra.mxu3 %v1105_v31  ;;  %v927_v31 = vld [vmem:[#allocation7 + $0x8] sm:$0xff] }
 0x372   : > { %v1094_v2 = vsel %vm376_vm8, %v1860_v1, %v1861_v30  ;;  %v1095_v6 = vsel %vm376_vm8, %v1861_v30, %v1865_v60  ;;  %v1092_v15 = vsel %vm376_vm8, %v1866_v37, %v1870_v19  ;;  %v1093_v7 = vsel %vm376_vm8, %v1870_v19, %v1871_v53 }
 0x376   : > { %v1889_v29 = vpop.permute.xlu2 %1888 }
 0x377   : > { %v1874_v51 = vpop.permute.xlu1 %1873  ;;  %v1894_v62 = vpop.permute.xlu0 %1893  ;;  %v1891_v36 = vunpack.i.h.bf16 %v1889_v29  ;;  %v1890_v5 = vunpack.i.l.bf16 %v1889_v29 }
 0x378   : > { %v1876_v12 = vunpack.i.h.bf16 %v1874_v51  ;;  %v1875_v39 = vunpack.i.l.bf16 %v1874_v51  ;;  %v1896_v34 = vunpack.i.h.bf16 %v1894_v62  ;;  %v1895_v10 = vunpack.i.l.bf16 %v1894_v62  ;;  %v928_v51 = vld [vmem:[#allocation7 + $0x10] sm:$0xff] }
 0x37a   : > { %v1102_v58 = vsel %vm376_vm8, %v1875_v39, %v1876_v12  ;;  %v1103_v49 = vsel %vm376_vm8, %v1876_v12, %v1825_v55  ;;  %v1088_v22 = vsel %vm376_vm8, %v1891_v36, %v1895_v10  ;;  %v1089_v3 = vsel %vm376_vm8, %v1895_v10, %v1896_v34 }
 0x37b   : > { %1175 = vmatpush.msra.mxu2 %v1102_v58  ;;  %1221 = vmatpush.msra.mxu3 %v1103_v49 }
 0x37d   : > { %1176 = vmatpush.msra.mxu2 %v1100_v52  ;;  %1222 = vmatpush.msra.mxu3 %v1101_v41 }
 0x37e   : > { %v1904_v46 = vpop.permute.xlu2 %1903 }
 0x37f   : > { %v1879_v17 = vpop.permute.xlu1 %1878  ;;  %v1909_v4 = vpop.permute.xlu0 %1908  ;;  %v1906_v16 = vunpack.i.h.bf16 %v1904_v46  ;;  %v1905_v45 = vunpack.i.l.bf16 %v1904_v46 }
 0x380   : > { %v1881_v23 = vunpack.i.h.bf16 %v1879_v17  ;;  %v1880_v18 = vunpack.i.l.bf16 %v1879_v17  ;;  %v1911_v32 = vunpack.i.h.bf16 %v1909_v4  ;;  %v1910_v56 = vunpack.i.l.bf16 %v1909_v4 }
 0x382   : > { %v1098_v54 = vsel %vm376_vm8, %v1880_v18, %v1881_v23  ;;  %v1099_v35 = vsel %vm376_vm8, %v1881_v23, %v1850_v48  ;;  %v1120_v50 = vsel %vm376_vm8, %v1906_v16, %v1910_v56  ;;  %v1121_v55 = vsel %vm376_vm8, %v1910_v56, %v1911_v32 }
 0x383   : > { %1177 = vmatpush.msra.mxu2 %v1098_v54  ;;  %1223 = vmatpush.msra.mxu3 %v1099_v35 }
 0x385   : > { %1178 = vmatpush.msra.mxu2 %v1096_v27  ;;  %1224 = vmatpush.msra.mxu3 %v1097_v63 }
 0x386   : > { %v959_v28 = vpop.permute.xlu2 %958 }
 0x387   : > { %v1884_v0 = vpop.permute.xlu1 %1883  ;;  %1179 = vmatpush.msra.mxu2 %v1094_v2  ;;  %1225 = vmatpush.msra.mxu3 %v1095_v6  ;;  %v963_v57 = vmul.f32 %v959_v28, %v2643_v8  ;;  %v967_v49 = vpop.permute.xlu0 %966 }
 0x388   : > { %v1886_v33 = vunpack.i.h.bf16 %v1884_v0  ;;  %v1885_v14 = vunpack.i.l.bf16 %v1884_v0 }
 0x389   : > { %1180 = vmatpush.msra.mxu2 %v1092_v15  ;;  %1226 = vmatpush.msra.mxu3 %v1093_v7 }
 0x38a   : > { %v1090_v21 = vsel %vm376_vm8, %v1885_v14, %v1886_v33  ;;  %v1091_v11 = vsel %vm376_vm8, %v1886_v33, %v1890_v5  ;;  %1278 = vperm.xlu0 %1916, %v963_v57  }
 0x38b   : > { %1181 = vmatpush.msra.mxu2 %v1090_v21  ;;  %1227 = vmatpush.msra.mxu3 %v1091_v11 }
 0x38d   : > { %1182 = vmatpush.msra.mxu2 %v1088_v22  ;;  %1228 = vmatpush.msra.mxu3 %v1089_v3 }
 0x38e   : > { %1183 = vmatmul.f32.vlgmr.msra.gmra.mxu2 %v926_v20  ;;  %1229 = vmatmul.f32.vlgmr.msra.gmra.mxu3 %v926_v20  ;;  %v1261_v42 = vpop.permute.xlu2 %1260 }
 0x38f   : > { %v1899_v13 = vpop.permute.xlu1 %1898 }
 0x390   : > { %v1901_v40 = vunpack.i.h.bf16 %v1899_v13  ;;  %v1900_v43 = vunpack.i.l.bf16 %v1899_v13 }
 0x392   : > { %v1122_v26 = vsel %vm376_vm8, %v1900_v43, %v1901_v40  ;;  %v1123_v47 = vsel %vm376_vm8, %v1901_v40, %v1905_v45  ;;  %1919 = vset.pattern.permute.xlu0 %v2083_v44 }
 0x393   : > { %1204 = vmatpush.msrb.mxu1 %v1122_v26  ;;  %1250 = vmatpush.msrb.mxu0 %v1123_v47 }
 0x395   : > { %1205 = vmatpush.msrb.mxu1 %v1120_v50  ;;  %1251 = vmatpush.msrb.mxu0 %v1121_v55 }
 0x396   : > { %1424 = vmatmul.msk.f32.vlgmr.msrb.gmra.mxu1 %vm1160_vm14, %v927_v31  ;;  %1426 = vmatmul.msk.f32.vlgmr.msrb.gmra.mxu0 %vm1160_vm14, %v927_v31 }
 0x397   : > { %1186 = vmatmul.f32.gmra.mxu2 %v928_v51  ;;  %1232 = vmatmul.f32.gmra.mxu3 %v928_v51  ;;  %v957_v12 = vpop.permute.xlu1 %956 }
 0x398   : > { %v962_v39 = vmul.f32 %v957_v12, %v2624_v9 }
 0x39a   : > { %1273 = vperm.xlu2 %1915, %v962_v39  }
 0x39e   : > { %1425 = vmatmul.msk.f32.gmra.mxu1 %vm1160_vm14, %v929_v38  ;;  %1427 = vmatmul.msk.f32.gmra.mxu0 %vm1160_vm14, %v929_v38 }
 0x39f   : > { %v972_v24 = vpop.permute.xlu1 %971 }
 0x3a2   : > { %1918 = vset.pattern.permute.xlu2 %v2083_v44 }
 0x3a3   : > { %1290 = vperm.xlu2 %1918, %v2643_v8  }
 0x3a8   : > { %v1265_v58 = vpop.permute.xlu1 %1264 }
 0x3b1   : > { %v1287_v44 = vpop.permute.xlu1 %1286 }
 0x3f4   : > { %v1274_v9 = vpop.permute.xlu2 %1273 }
 0x3fc   : > { %v1279_v36 = vpop.permute.xlu0 %1278 }
 0x3fd   : > { %v1291_v15 = vpop.permute.xlu2 %1290 }
 0x411   : > { %v1184_v52 = vpop.f32.mrf.mxu2  ;;  %v1230_v41 = vpop.f32.mrf.mxu3 }
 0x412   : > { %v1185_v59 = vadd.f32 %v1184_v52, %v967_v49  ;;  %v1231_v48 = vadd.f32 %v1230_v41, %v967_v49 }
 0x413   : > { %v1207_v17 = vpop.f32.mrf.mxu1  ;;  %v1253_v25 = vpop.f32.mrf.mxu0 }
 0x414   : > { %v1208_v61 = vadd.f32 %v1207_v17, %v1185_v59  ;;  %v1254_v29 = vadd.f32 %v1253_v25, %v1231_v48 }
 0x416   : > { %v1267_v23 = vsub.f32 %v1208_v61, %v1261_v42  ;;  %v1268_v18 = vsub.f32 %v1254_v29, %v1261_v42 }
 0x418   : > { %v1281_v8 = vmul.f32 %v1274_v9, %v1267_v23  ;;  %v1282_v60 = vmul.f32 %v1274_v9, %v1268_v18 }
 0x41a   : > { %v1293_v30 = vadd.f32 %v1287_v44, %v1281_v8  ;;  %v1294_v1 = vadd.f32 %v1287_v44, %v1282_v60  ;;  %v1187_v54 = vpop.f32.mrf.mxu2  ;;  %v1233_v35 = vpop.f32.mrf.mxu3 }
 0x41b   : > { %v1188_v37 = vadd.f32 %v1187_v54, %v972_v24  ;;  %v1234_v53 = vadd.f32 %v1233_v35, %v972_v24  ;;  %v1210_v19 = vpop.f32.mrf.mxu1  ;;  %v1256_v62 = vpop.f32.mrf.mxu0 }
 0x41c   : > { %v1297_v27 = vmax.f32 %v1293_v30, 0.0  ;;  %v1298_v63 = vmax.f32 %v1294_v1, 0.0 }
 0x41d   : > { %v1211_v2 = vadd.f32 %v1210_v19, %v1188_v37  ;;  %v1257_v6 = vadd.f32 %v1256_v62, %v1234_v53 }
 0x41e   : > { %1301 = vst [vmem:[%s251_s17] sm:$0xff] %v1297_v27 }
 0x41f   : > { %1302 = vst [vmem:[%s251_s17 + $0x8] sm:$0xff] %v1298_v63  ;;  %v1269_v5 = vsub.f32 %v1211_v2, %v1265_v58  ;;  %v1270_v0 = vsub.f32 %v1257_v6, %v1265_v58 }
 0x421   : > { %v1283_v7 = vmul.f32 %v1279_v36, %v1269_v5  ;;  %v1284_v34 = vmul.f32 %v1279_v36, %v1270_v0 }
 0x423   : > { %v1295_v10 = vadd.f32 %v1291_v15, %v1283_v7  ;;  %v1296_v33 = vadd.f32 %v1291_v15, %v1284_v34 }
 0x425   : > { %v1299_v14 = vmax.f32 %v1295_v10, 0.0  ;;  %v1300_v46 = vmax.f32 %v1296_v33, 0.0 }
 0x427   : > { %1303 = vst [vmem:[%s251_s17 + $0x10] sm:$0xff] %v1299_v14 }
 0x428   : > { %1304 = vst [vmem:[%s251_s17 + $0x18] sm:$0xff] %v1300_v46 }
 0x429   : > { %2015 = shalt.err (!%p2012_p8)
}
 0x42a   : > { %s2084_s11 = smov 256   ;;  %s2085_s15 = smov 16  }
 0x42b   : > { %1443 = dma.vmem_to_hbm [thread:$0]  (%p2154_p5), %s1319_s7, 512, %s1321_s8, %s1306_s22, %s2084_s11, %s2084_s11, %s2085_s15  }
 0x42c PF: > { %p1460_p9 = scmp.ge.s32.totalorder %s2058_s21, 2  ;;  %s1335_s16 = sand.u32 1, %s2046_s18  }
 0x42d   : > { %s1336_s17 = scalar_lea.sflag [#allocation6], %s1335_s16 }
 0x42e   : > { %p1453_p10 = pnand %p1460_p9, %p2158_p6 }
 0x430   : > { %p1454_p11 = pneg %p1453_p10 }
 0x432   : > { %2041 = dma.done.wait (%p1454_p11), %s1336_s17, 512  }
 0x433   : > { %2043 = vsyncadd (%p1454_p11), %s1336_s17, 4294966784  ;;  %p17_p12 = scmp.ge.s32.totalorder %s2141_s24, 4   ;;  %s2754_s18 = smov %s2050_s19 }
 0x434   : > { %s2755_s19 = smov %s2054_s20  ;;  %s2756_s20 = smov %s2152_s27 }
 0x435   : > { %s2757_s21 = smov %s2141_s24  ;;  %19 = sbr.rel (!%p17_p12) target bundleno = 5 (0x5), region = 84 }
 0x43a   :  { %1342 = vsyncpa [#allocation5], 1 }
 0x43b   :  { %1344 = vsyncpa [#allocation5 + $0x1], 1 }
 0x43c   :  { %1345 = vsyncpa [#allocation8], 1 }
 0x43d   :  { %1346 = vsyncpa [#allocation6], 1 }
 0x43e   :  { %1348 = vsyncpa [#allocation6 + $0x1], 1 }

</bundles_post_ra>
